<compile_context>
chip_gen: v7x
topology: tpu7x:2x2x1
jax: 0.10.0
libtpu: 0.0.40
codegen_flags: <defaults>
</compile_context>

<pallas_src>
import functools
import math

import jax
import jax.numpy as jnp
from jax import lax
from jax.experimental import pallas as pl
from jax.experimental.pallas import tpu as pltpu

MXU_DTYPE = jnp.bfloat16          # MXU operand dtype (accumulation is always f32)
VMEM_LIMIT = 48 * 1024 * 1024     # explicit scoped-VMEM budget (fits v7x 64 MiB phys)


def _tile_m(M, cap=512):
    """Row-tile size: full M when small, else cap (~85% of HBM roofline at 512)."""
    return M if M <= cap else cap


def _wspec(shape):
    """Grid-invariant weight BlockSpec: resident, single-buffered."""
    return pl.BlockSpec(shape, lambda *_: tuple(0 for _ in shape),
                        pipeline_mode=pl.Buffered(1))


# ----------------------------------------------------------------------------
# Fused linear projection:  y = act((x [+ x2]) @ W + b), tiled over rows.
# ----------------------------------------------------------------------------
def _linear_kernel(*refs, act, pre_add, mxu_dtype):
    it = iter(refs)
    x_ref = next(it)
    x2_ref = next(it) if pre_add else None
    w_ref = next(it)
    b_ref = next(it)
    o_ref = next(it)

    x = x_ref[...]
    if pre_add:
        x = x + x2_ref[...]
    y = jnp.dot(x.astype(mxu_dtype), w_ref[...].astype(mxu_dtype),
                preferred_element_type=jnp.float32)
    y = y + b_ref[...]
    if act == "relu":
        y = jnp.maximum(y, 0.0)
    o_ref[...] = y.astype(o_ref.dtype)


def linear_pallas(x, w, b, *, x2=None, act=None, out_dtype=jnp.float32):
    """y = act((x [+ x2]) @ w + b). x/x2:(M,K) f32, w:(K,N) bf16/f32, b:(N,)."""
    M, K = x.shape
    N = w.shape[1]
    TM = _tile_m(M)
    pre_add = x2 is not None
    kernel = functools.partial(_linear_kernel, act=act, pre_add=pre_add,
                               mxu_dtype=MXU_DTYPE)

    in_specs = [pl.BlockSpec((TM, K), lambda i: (i, 0))]
    args = [x]
    if pre_add:
        in_specs.append(pl.BlockSpec((TM, K), lambda i: (i, 0)))
        args.append(x2)
    in_specs += [_wspec((K, N)),          # weight: resident, single-buffered
                 _wspec((1, N))]          # bias
    args += [w, b.reshape(1, N)]

    flops = 2 * M * K * N
    bytes_acc = (sum(int(a.size) * a.dtype.itemsize for a in args)
                 + M * N * jnp.dtype(out_dtype).itemsize)
    return pl.pallas_call(
        kernel,
        out_shape=jax.ShapeDtypeStruct((M, N), out_dtype),
        grid=(pl.cdiv(M, TM),),
        in_specs=in_specs,
        out_specs=pl.BlockSpec((TM, N), lambda i: (i, 0)),
        compiler_params=pltpu.CompilerParams(dimension_semantics=("parallel",),
                                             vmem_limit_bytes=VMEM_LIMIT),
        cost_estimate=pl.CostEstimate(flops=flops, transcendentals=0,
                                      bytes_accessed=bytes_acc),
    )(*args)


# ----------------------------------------------------------------------------
# Fused self-attention Q/K/V projection:
#   q  = (tgt + pos) @ Wqk[:, :D] + bqk[:D]
#   kv = [(tgt + pos) @ Wqk[:, D:] + bqk[D:]  |  tgt @ Wv + bv]
# Loads tgt/pos once; emits bf16.
# ----------------------------------------------------------------------------
def _selfattn_proj_kernel(tgt_ref, pos_ref, wqk_ref, bqk_ref, wv_ref, bv_ref,
                          q_ref, kv_ref, *, mxu_dtype):
    D = wv_ref.shape[1]
    t = tgt_ref[...]
    xp = (t + pos_ref[...]).astype(mxu_dtype)
    qk = jnp.dot(xp, wqk_ref[...].astype(mxu_dtype),
                 preferred_element_type=jnp.float32) + bqk_ref[...]
    v = jnp.dot(t.astype(mxu_dtype), wv_ref[...].astype(mxu_dtype),
                preferred_element_type=jnp.float32) + bv_ref[...]
    q_ref[...] = qk[:, :D].astype(q_ref.dtype)
    kv_ref[...] = jnp.concatenate([qk[:, D:], v], axis=-1).astype(kv_ref.dtype)


def self_attn_proj_pallas(tgt2d, pos2d, w_qk, b_qk, w_v, b_v, *, out_dtype=MXU_DTYPE):
    M, D = tgt2d.shape
    TM = _tile_m(M)
    kernel = functools.partial(_selfattn_proj_kernel, mxu_dtype=MXU_DTYPE)
    args = [tgt2d, pos2d, w_qk, b_qk.reshape(1, 2 * D), w_v, b_v.reshape(1, D)]
    in_specs = [pl.BlockSpec((TM, D), lambda i: (i, 0)),
                pl.BlockSpec((TM, D), lambda i: (i, 0)),
                _wspec((D, 2 * D)), _wspec((1, 2 * D)),
                _wspec((D, D)), _wspec((1, D))]
    flops = 6 * M * D * D
    bytes_acc = (sum(int(a.size) * a.dtype.itemsize for a in args)
                 + 3 * M * D * jnp.dtype(out_dtype).itemsize)
    return pl.pallas_call(
        kernel,
        out_shape=(jax.ShapeDtypeStruct((M, D), out_dtype),
                   jax.ShapeDtypeStruct((M, 2 * D), out_dtype)),
        grid=(pl.cdiv(M, TM),),
        in_specs=in_specs,
        out_specs=(pl.BlockSpec((TM, D), lambda i: (i, 0)),
                   pl.BlockSpec((TM, 2 * D), lambda i: (i, 0))),
        compiler_params=pltpu.CompilerParams(dimension_semantics=("parallel",),
                                             vmem_limit_bytes=VMEM_LIMIT),
        cost_estimate=pl.CostEstimate(flops=flops, transcendentals=0,
                                      bytes_accessed=bytes_acc),
    )(*args)


# ----------------------------------------------------------------------------
# Fused multi-head attention block, grid over (batch, Lq-tile):
#   per-head softmax(QK^T/sqrt(hd) [+ bias]) @ V  ->  one (Lq,D)@(D,D) out-proj
#   -> residual add -> LayerNorm, all in one kernel.
# ----------------------------------------------------------------------------
def _attn_block_kernel(*refs, n_heads, head_dim, scale, has_bias, eps, mxu_dtype):
    it = iter(refs)
    q_ref = next(it)                                 # (1, TLQ, D)  bf16
    kv_ref = next(it)                                # (1, Lk, 2D)  bf16
    bias_ref = next(it) if has_bias else None        # (1, 1, Lk)   f32 (0 / -1e30)
    res_ref = next(it)                               # (1, TLQ, D)  f32 residual
    wo_ref = next(it)                                # (D, D)       bf16 (= W_o^T)
    bo_ref = next(it)                                # (1, D)       f32
    g_ref = next(it)                                 # (1, D)       LayerNorm gamma
    be_ref = next(it)                                # (1, D)       LayerNorm beta
    o_ref = next(it)                                 # (1, TLQ, D)  f32

    D = o_ref.shape[-1]
    hd = head_dim

    q = q_ref[0]                                     # (TLQ, D)  bf16 (cast once in proj)
    kv = kv_ref[0]                                   # (Lk, 2D)  bf16
    k = kv[:, :D]
    v = kv[:, D:]
    bias = bias_ref[0] if has_bias else None         # (1, Lk), broadcasts over rows

    ctx_parts = []
    for h in range(n_heads):                         # static unroll over heads
        lo = h * hd
        q_h = q[:, lo:lo + hd]
        k_h = k[:, lo:lo + hd]
        v_h = v[:, lo:lo + hd]

        # scores: contract last dims directly (no materialized k.T)
        s = lax.dot_general(q_h, k_h, (((1,), (1,)), ((), ())),
                            preferred_element_type=jnp.float32) * scale   # (TLQ, Lk)
        if has_bias:
            s = s + bias
        # TODO(synk): fully-masked rows give a uniform distribution over padded keys
        # (matches neither NaN nor zero); benign as long as such rows never occur.
        m = jnp.max(s, axis=-1, keepdims=True)
        p = jnp.exp(s - m)
        denom = jnp.sum(p, axis=-1, keepdims=True)
        p = p * pl.reciprocal(denom, approx=True)     # EUP slot: free-ish divide
        ctx_parts.append(jnp.dot(p.astype(mxu_dtype), v_h,
                                 preferred_element_type=jnp.float32).astype(mxu_dtype))

    # single full-width out-projection: one K=D matmul instead of n_heads K=hd matmuls
    ctx = jnp.concatenate(ctx_parts, axis=-1) if n_heads > 1 else ctx_parts[0]
    y = jnp.dot(ctx, wo_ref[...], preferred_element_type=jnp.float32) + bo_ref[...]

    z = res_ref[0] + y                               # residual add (f32)
    mean = jnp.mean(z, axis=-1, keepdims=True)
    var = jnp.mean(jnp.square(z - mean), axis=-1, keepdims=True)
    zn = (z - mean) * lax.rsqrt(var + eps)
    o_ref[0] = (zn * g_ref[...] + be_ref[...]).astype(o_ref.dtype)


def attention_block_pallas(q, kv, bias, residual, wo, bo, gamma, beta,
                           *, n_heads, eps=1e-5, lq_tile=128):
    """Fused MHA + out-proj + residual + LayerNorm; grid over (batch, Lq-tile)."""
    B, Lq, D = q.shape
    _, Lk, _ = kv.shape
    hd = D // n_heads
    scale = 1.0 / math.sqrt(hd)
    has_bias = bias is not None
    TLQ = lq_tile if (Lq % lq_tile == 0) else Lq     # bounds per-step score residency

    kernel = functools.partial(
        _attn_block_kernel, n_heads=n_heads, head_dim=hd, scale=scale,
        has_bias=has_bias, eps=eps, mxu_dtype=MXU_DTYPE)

    in_specs = [pl.BlockSpec((1, TLQ, D), lambda b, i: (b, i, 0)),
                pl.BlockSpec((1, Lk, 2 * D), lambda b, i: (b, 0, 0))]
    args = [q, kv]
    if has_bias:
        in_specs.append(pl.BlockSpec((1, 1, Lk), lambda b, i: (b, 0, 0)))
        args.append(bias)
    in_specs += [pl.BlockSpec((1, TLQ, D), lambda b, i: (b, i, 0)),   # residual
                 _wspec((D, D)),                                      # wo (resident)
                 _wspec((1, D)),                                      # bo
                 _wspec((1, D)),                                      # gamma
                 _wspec((1, D))]                                      # beta
    args += [residual, wo, bo.reshape(1, D), gamma.reshape(1, D), beta.reshape(1, D)]

    flops = 2 * B * n_heads * (2 * Lq * Lk * hd) + 2 * B * Lq * D * D
    bytes_acc = sum(int(a.size) * a.dtype.itemsize for a in args) + B * Lq * D * 4
    return pl.pallas_call(
        kernel,
        out_shape=jax.ShapeDtypeStruct((B, Lq, D), jnp.float32),
        grid=(B, Lq // TLQ),
        in_specs=in_specs,
        out_specs=pl.BlockSpec((1, TLQ, D), lambda b, i: (b, i, 0)),
        compiler_params=pltpu.CompilerParams(
            dimension_semantics=("parallel", "parallel"),
            vmem_limit_bytes=VMEM_LIMIT),
        cost_estimate=pl.CostEstimate(
            flops=flops, transcendentals=B * n_heads * Lq * Lk,
            bytes_accessed=bytes_acc),
    )(*args)


# ----------------------------------------------------------------------------
# Fused FFN block:  LayerNorm(x + linear2(relu(linear1(x)))), hidden stays on-chip.
# ----------------------------------------------------------------------------
def _ffn_kernel(x_ref, w1_ref, b1_ref, w2_ref, b2_ref, g_ref, be_ref, o_ref,
                *, eps, mxu_dtype):
    x = x_ref[...]
    h = jnp.dot(x.astype(mxu_dtype), w1_ref[...].astype(mxu_dtype),
                preferred_element_type=jnp.float32) + b1_ref[...]
    h = jnp.maximum(h, 0.0)
    y = jnp.dot(h.astype(mxu_dtype), w2_ref[...].astype(mxu_dtype),
                preferred_element_type=jnp.float32) + b2_ref[...]
    z = x + y
    mean = jnp.mean(z, axis=-1, keepdims=True)
    var = jnp.mean(jnp.square(z - mean), axis=-1, keepdims=True)
    zn = (z - mean) * lax.rsqrt(var + eps)
    o_ref[...] = (zn * g_ref[...] + be_ref[...]).astype(o_ref.dtype)


def ffn_block_pallas(x, w1, b1, w2, b2, gamma, beta, *, eps=1e-5):
    M, D = x.shape
    F = w1.shape[1]
    TM = _tile_m(M)
    kernel = functools.partial(_ffn_kernel, eps=eps, mxu_dtype=MXU_DTYPE)
    args = [x, w1, b1.reshape(1, F), w2, b2.reshape(1, D),
            gamma.reshape(1, D), beta.reshape(1, D)]
    in_specs = [
        pl.BlockSpec((TM, D), lambda i: (i, 0)),
        _wspec((D, F)), _wspec((1, F)),
        _wspec((F, D)), _wspec((1, D)),
        _wspec((1, D)), _wspec((1, D)),
    ]
    flops = 4 * M * D * F
    bytes_acc = sum(int(a.size) * a.dtype.itemsize for a in args) + M * D * 4
    return pl.pallas_call(
        kernel,
        out_shape=jax.ShapeDtypeStruct((M, D), jnp.float32),
        grid=(pl.cdiv(M, TM),),
        in_specs=in_specs,
        out_specs=pl.BlockSpec((TM, D), lambda i: (i, 0)),
        compiler_params=pltpu.CompilerParams(dimension_semantics=("parallel",),
                                             vmem_limit_bytes=VMEM_LIMIT),
        cost_estimate=pl.CostEstimate(flops=flops, transcendentals=0,
                                      bytes_accessed=bytes_acc),
    )(*args)


# ----------------------------------------------------------------------------
# SpanAttentionLayer forward
# ----------------------------------------------------------------------------
def span_attention_layer(params, tgt, pos, src, mask, self_attn=True, n_heads=4):
    B, Lq, D = tgt.shape
    Lk = src.shape[1]
    assert D % n_heads == 0, "d_model must be divisible by n_heads"

    pos2d = pos.reshape(B * Lq, D)

    # --- self attention block: q = k = tgt + pos, v = tgt; norm2 ---
    if self_attn:
        q, kv = self_attn_proj_pallas(tgt.reshape(B * Lq, D), pos2d,
                                      params["sa_w_qk"], params["sa_b_qk"],
                                      params["sa_w_v"], params["sa_b_v"])
        tgt = attention_block_pallas(
            q.reshape(B, Lq, D), kv.reshape(B, Lq, 2 * D), None, tgt,
            params["sa_wo"], params["sa_bo"], params["norm2_g"], params["norm2_b"],
            n_heads=n_heads)

    # --- cross attention block: q = tgt + pos, k = v = src; key-padding mask; norm1 ---
    tgt2d = tgt.reshape(B * Lq, D)
    q = linear_pallas(tgt2d, params["ca_w_q"], params["ca_b_q"], x2=pos2d,
                      out_dtype=MXU_DTYPE)
    kv = linear_pallas(src.reshape(B * Lk, D), params["ca_w_kv"], params["ca_b_kv"],
                       out_dtype=MXU_DTYPE)
    bias = None
    if mask is not None:
        # additive key-padding bias, shared across heads: (B, 1, Lk)
        bias = jnp.where(mask[:, None, :], 0.0, -1e30).astype(jnp.float32)
    tgt = attention_block_pallas(
        q.reshape(B, Lq, D), kv.reshape(B, Lk, 2 * D), bias, tgt,
        params["ca_wo"], params["ca_bo"], params["norm1_g"], params["norm1_b"],
        n_heads=n_heads)

    # --- FFN block (dropout = identity): norm3 ---
    out = ffn_block_pallas(tgt.reshape(B * Lq, D), params["w1"], params["b1"],
                           params["w2"], params["b2"],
                           params["norm3_g"], params["norm3_b"])
    return out.reshape(B, Lq, D)


# ----------------------------------------------------------------------------
# Parameters: weights stored pre-transposed to (in, out) and Q/K (resp. K/V)
# fused along the output dim; all matmul weights (incl. out-proj) in bf16.
# ----------------------------------------------------------------------------
def init_params(key, d_model, d_ffn, w_dtype=MXU_DTYPE):
    D, F = d_model, d_ffn
    ks = jax.random.split(key, 16)
    s = 0.05

    def w(k, shape, dtype):
        return (jax.random.normal(k, shape, jnp.float32) * s).astype(dtype)

    def b(k, shape):
        return jax.random.normal(k, shape, jnp.float32) * s

    return {
        # self-attention
        "sa_w_qk": w(ks[0], (D, 2 * D), w_dtype),
        "sa_b_qk": b(ks[1], (2 * D,)),
        "sa_w_v": w(ks[2], (D, D), w_dtype),
        "sa_b_v": b(ks[3], (D,)),
        "sa_wo": w(ks[4], (D, D), w_dtype),
        "sa_bo": b(ks[5], (D,)),
        # cross-attention
        "ca_w_q": w(ks[6], (D, D), w_dtype),
        "ca_b_q": b(ks[7], (D,)),
        "ca_w_kv": w(ks[8], (D, 2 * D), w_dtype),
        "ca_b_kv": b(ks[9], (2 * D,)),
        "ca_wo": w(ks[10], (D, D), w_dtype),
        "ca_bo": b(ks[11], (D,)),
        # FFN
        "w1": w(ks[12], (D, F), w_dtype),
        "b1": b(ks[13], (F,)),
        "w2": w(ks[14], (F, D), w_dtype),
        "b2": b(ks[15], (D,)),
        # LayerNorms (PyTorch default init)
        "norm1_g": jnp.ones((D,), jnp.float32), "norm1_b": jnp.zeros((D,), jnp.float32),
        "norm2_g": jnp.ones((D,), jnp.float32), "norm2_b": jnp.zeros((D,), jnp.float32),
        "norm3_g": jnp.ones((D,), jnp.float32), "norm3_b": jnp.zeros((D,), jnp.float32),
    }


# ----------------------------------------------------------------------------
# Pure-JAX reference (f32) for a sanity check of the fused kernels.
# ----------------------------------------------------------------------------
def _reference(params, tgt, pos, src, mask, self_attn, n_heads):
    D = tgt.shape[-1]
    hd = D // n_heads
    f32 = lambda a: a.astype(jnp.float32)

    def attn(q_in, k_in, v_in, wq, bq, wk, bk, wv, bv, wo, bo, key_valid):
        B, Lq, _ = q_in.shape
        Lk = k_in.shape[1]
        q = q_in @ f32(wq) + bq
        k = k_in @ f32(wk) + bk
        v = v_in @ f32(wv) + bv
        qh = q.reshape(B, Lq, n_heads, hd).transpose(0, 2, 1, 3)
        kh = k.reshape(B, Lk, n_heads, hd).transpose(0, 2, 1, 3)
        vh = v.reshape(B, Lk, n_heads, hd).transpose(0, 2, 1, 3)
        s = jnp.einsum("bhqd,bhkd->bhqk", qh, kh) / math.sqrt(hd)
        if key_valid is not None:
            s = jnp.where(key_valid[:, None, None, :], s, -1e30)
        p = jax.nn.softmax(s, axis=-1)
        ctx = jnp.einsum("bhqk,bhkd->bhqd", p, vh)
        ctx = ctx.transpose(0, 2, 1, 3).reshape(B, Lq, D)
        return ctx @ f32(wo) + bo

    def ln(x, g, b, eps=1e-5):
        mu = x.mean(-1, keepdims=True)
        var = ((x - mu) ** 2).mean(-1, keepdims=True)
        return (x - mu) / jnp.sqrt(var + eps) * g + b

    out = tgt
    if self_attn:
        qk_in = out + pos
        t2 = attn(qk_in, qk_in, out,
                  params["sa_w_qk"][:, :D], params["sa_b_qk"][:D],
                  params["sa_w_qk"][:, D:], params["sa_b_qk"][D:],
                  params["sa_w_v"], params["sa_b_v"],
                  params["sa_wo"], params["sa_bo"], None)
        out = ln(out + t2, params["norm2_g"], params["norm2_b"])
    q_in = out + pos
    t2 = attn(q_in, src, src,
              params["ca_w_q"], params["ca_b_q"],
              params["ca_w_kv"][:, :D], params["ca_b_kv"][:D],
              params["ca_w_kv"][:, D:], params["ca_b_kv"][D:],
              params["ca_wo"], params["ca_bo"], mask)
    out = ln(out + t2, params["norm1_g"], params["norm1_b"])
    h = jnp.maximum(out @ f32(params["w1"]) + params["b1"], 0.0)
    t2 = h @ f32(params["w2"]) + params["b2"]
    out = ln(out + t2, params["norm3_g"], params["norm3_b"])
    return out


if __name__ == "__main__":
    # small but lane-dense test shapes (d_model multiple of 128)
    B, Lq, Lk = 2, 8, 16
    d_model, d_ffn, n_heads = 128, 256, 4

    key = jax.random.PRNGKey(0)
    kp, kt, kpos, ks = jax.random.split(key, 4)

    params = init_params(kp, d_model, d_ffn)
    tgt = jax.random.normal(kt, (B, Lq, d_model), jnp.float32)
    pos = jax.random.normal(kpos, (B, Lq, d_model), jnp.float32)
    src = jax.random.normal(ks, (B, Lk, d_model), jnp.float32)
    # mask: True = valid key (module applies ~mask as key_padding_mask)
    valid_lens = jnp.array([Lk, Lk - 4])
    mask = jnp.arange(Lk)[None, :] < valid_lens[:, None]

    fwd = jax.jit(functools.partial(span_attention_layer,
                                    self_attn=True, n_heads=n_heads))
    out = fwd(params, tgt, pos, src, mask)
    jax.block_until_ready(out)

    assert out.shape == (B, Lq, d_model)
    assert bool(jnp.all(jnp.isfinite(out)))

    ref = _reference(params, tgt, pos, src, mask, True, n_heads)
    max_err = float(jnp.max(jnp.abs(out - ref)))
    # bf16 MXU operands / bf16 intermediates + approx reciprocal: generous tolerance
    assert max_err < 0.35, f"mismatch vs f32 reference: max |err| = {max_err}"
    print("KERNEL_OK")
</pallas_src>

<mosaic_0001>
module attributes {stable_mosaic.version = 11 : i64} {
  func.func @_attn_block_kernel(%arg0: i32, %arg1: i32, %arg2: memref<1x8x128xbf16, #tpu.memory_space<vmem>>, %arg3: memref<1x8x256xbf16, #tpu.memory_space<vmem>>, %arg4: memref<1x8x128xf32, #tpu.memory_space<vmem>>, %arg5: memref<128x128xbf16, #tpu.memory_space<vmem>>, %arg6: memref<1x128xf32, #tpu.memory_space<vmem>>, %arg7: memref<1x128xf32, #tpu.memory_space<vmem>>, %arg8: memref<1x128xf32, #tpu.memory_space<vmem>>, %arg9: memref<1x8x128xf32, #tpu.memory_space<vmem>>) attributes {dimension_semantics = [#tpu.dimension_semantics<parallel>, #tpu.dimension_semantics<parallel>], iteration_bounds = array<i64: 2, 1>, scalar_prefetch = 0 : i64, scratch_operands = 0 : i64, tpu.core_type = #tpu.core_type<tc>, window_params = [{transform_indices = @transform_0, window_bounds = array<i64: 1, 8, 128>}, {transform_indices = @transform_1, window_bounds = array<i64: 1, 8, 256>}, {transform_indices = @transform_2, window_bounds = array<i64: 1, 8, 128>}, {pipeline_mode = #tpu.pipeline_mode<synchronous>, transform_indices = @transform_3, window_bounds = array<i64: 128, 128>}, {pipeline_mode = #tpu.pipeline_mode<synchronous>, transform_indices = @transform_4, window_bounds = array<i64: 1, 128>}, {pipeline_mode = #tpu.pipeline_mode<synchronous>, transform_indices = @transform_5, window_bounds = array<i64: 1, 128>}, {pipeline_mode = #tpu.pipeline_mode<synchronous>, transform_indices = @transform_6, window_bounds = array<i64: 1, 128>}, {transform_indices = @transform_7, window_bounds = array<i64: 1, 8, 128>}]} {
    %c0 = arith.constant 0 : index
    %c0_0 = arith.constant 0 : index
    %c0_1 = arith.constant 0 : index
    %0 = vector.load %arg2[%c0, %c0_0, %c0_1] : memref<1x8x128xbf16, #tpu.memory_space<vmem>>, vector<1x8x128xbf16>
    %1 = vector.shape_cast %0 : vector<1x8x128xbf16> to vector<8x128xbf16>
    %c0_2 = arith.constant 0 : index
    %c0_3 = arith.constant 0 : index
    %c0_4 = arith.constant 0 : index
    %2 = vector.load %arg3[%c0_2, %c0_3, %c0_4] : memref<1x8x256xbf16, #tpu.memory_space<vmem>>, vector<1x8x256xbf16>
    %3 = vector.shape_cast %2 : vector<1x8x256xbf16> to vector<8x256xbf16>
    %4 = vector.extract_strided_slice %3 {offsets = [0, 0], sizes = [8, 128], strides = [1, 1]} : vector<8x256xbf16> to vector<8x128xbf16>
    %5 = vector.extract_strided_slice %3 {offsets = [0, 128], sizes = [8, 128], strides = [1, 1]} : vector<8x256xbf16> to vector<8x128xbf16>
    %6 = vector.extract_strided_slice %1 {offsets = [0, 0], sizes = [8, 32], strides = [1, 1]} : vector<8x128xbf16> to vector<8x32xbf16>
    %7 = vector.extract_strided_slice %4 {offsets = [0, 0], sizes = [8, 32], strides = [1, 1]} : vector<8x128xbf16> to vector<8x32xbf16>
    %8 = vector.extract_strided_slice %5 {offsets = [0, 0], sizes = [8, 32], strides = [1, 1]} : vector<8x128xbf16> to vector<8x32xbf16>
    %cst = arith.constant dense<0.000000e+00> : vector<8x8xf32>
    %9 = tpu.matmul %6, %7, %cst {dimension_numbers = #tpu.dot_dimension_numbers<[1], [1], [0], [0], [0, 0, 1, 0], [], []>} : vector<8x32xbf16>, vector<8x32xbf16>, vector<8x8xf32> -> vector<8x8xf32>
    %cst_5 = arith.constant 0.176776692 : f32
    %10 = vector.broadcast %cst_5 : f32 to vector<8x8xf32>
    %11 = arith.mulf %9, %10 : vector<8x8xf32>
    %cst_6 = arith.constant dense<0xFF800000> : vector<8xf32>
    %12 = vector.multi_reduction <maximumf>, %11, %cst_6 [1] : vector<8x8xf32> to vector<8xf32>
    %13 = vector.shape_cast %12 : vector<8xf32> to vector<8x1xf32>
    %14 = vector.broadcast %13 : vector<8x1xf32> to vector<8x8xf32>
    %15 = arith.subf %11, %14 : vector<8x8xf32>
    %16 = math.exp %15 : vector<8x8xf32>
    %cst_7 = arith.constant dense<0.000000e+00> : vector<8xf32>
    %17 = vector.multi_reduction <add>, %16, %cst_7 [1] : vector<8x8xf32> to vector<8xf32>
    %18 = vector.shape_cast %17 : vector<8xf32> to vector<8x1xf32>
    %19 = tpu.reciprocal %18 {approx = true} : vector<8x1xf32> -> vector<8x1xf32>
    %20 = vector.broadcast %19 : vector<8x1xf32> to vector<8x8xf32>
    %21 = arith.mulf %16, %20 : vector<8x8xf32>
    %22 = arith.truncf %21 : vector<8x8xf32> to vector<8x8xbf16>
    %cst_8 = arith.constant dense<0.000000e+00> : vector<8x32xf32>
    %23 = tpu.matmul %22, %8, %cst_8 {dimension_numbers = #tpu.dot_dimension_numbers<[1], [0], [0], [1], [0, 0, 1, 1], [], []>} : vector<8x8xbf16>, vector<8x32xbf16>, vector<8x32xf32> -> vector<8x32xf32>
    %24 = arith.truncf %23 : vector<8x32xf32> to vector<8x32xbf16>
    %25 = vector.extract_strided_slice %1 {offsets = [0, 32], sizes = [8, 32], strides = [1, 1]} : vector<8x128xbf16> to vector<8x32xbf16>
    %26 = vector.extract_strided_slice %4 {offsets = [0, 32], sizes = [8, 32], strides = [1, 1]} : vector<8x128xbf16> to vector<8x32xbf16>
    %27 = vector.extract_strided_slice %5 {offsets = [0, 32], sizes = [8, 32], strides = [1, 1]} : vector<8x128xbf16> to vector<8x32xbf16>
    %cst_9 = arith.constant dense<0.000000e+00> : vector<8x8xf32>
    %28 = tpu.matmul %25, %26, %cst_9 {dimension_numbers = #tpu.dot_dimension_numbers<[1], [1], [0], [0], [0, 0, 1, 0], [], []>} : vector<8x32xbf16>, vector<8x32xbf16>, vector<8x8xf32> -> vector<8x8xf32>
    %cst_10 = arith.constant 0.176776692 : f32
    %29 = vector.broadcast %cst_10 : f32 to vector<8x8xf32>
    %30 = arith.mulf %28, %29 : vector<8x8xf32>
    %cst_11 = arith.constant dense<0xFF800000> : vector<8xf32>
    %31 = vector.multi_reduction <maximumf>, %30, %cst_11 [1] : vector<8x8xf32> to vector<8xf32>
    %32 = vector.shape_cast %31 : vector<8xf32> to vector<8x1xf32>
    %33 = vector.broadcast %32 : vector<8x1xf32> to vector<8x8xf32>
    %34 = arith.subf %30, %33 : vector<8x8xf32>
    %35 = math.exp %34 : vector<8x8xf32>
    %cst_12 = arith.constant dense<0.000000e+00> : vector<8xf32>
    %36 = vector.multi_reduction <add>, %35, %cst_12 [1] : vector<8x8xf32> to vector<8xf32>
    %37 = vector.shape_cast %36 : vector<8xf32> to vector<8x1xf32>
    %38 = tpu.reciprocal %37 {approx = true} : vector<8x1xf32> -> vector<8x1xf32>
    %39 = vector.broadcast %38 : vector<8x1xf32> to vector<8x8xf32>
    %40 = arith.mulf %35, %39 : vector<8x8xf32>
    %41 = arith.truncf %40 : vector<8x8xf32> to vector<8x8xbf16>
    %cst_13 = arith.constant dense<0.000000e+00> : vector<8x32xf32>
    %42 = tpu.matmul %41, %27, %cst_13 {dimension_numbers = #tpu.dot_dimension_numbers<[1], [0], [0], [1], [0, 0, 1, 1], [], []>} : vector<8x8xbf16>, vector<8x32xbf16>, vector<8x32xf32> -> vector<8x32xf32>
    %43 = arith.truncf %42 : vector<8x32xf32> to vector<8x32xbf16>
    %44 = vector.extract_strided_slice %1 {offsets = [0, 64], sizes = [8, 32], strides = [1, 1]} : vector<8x128xbf16> to vector<8x32xbf16>
    %45 = vector.extract_strided_slice %4 {offsets = [0, 64], sizes = [8, 32], strides = [1, 1]} : vector<8x128xbf16> to vector<8x32xbf16>
    %46 = vector.extract_strided_slice %5 {offsets = [0, 64], sizes = [8, 32], strides = [1, 1]} : vector<8x128xbf16> to vector<8x32xbf16>
    %cst_14 = arith.constant dense<0.000000e+00> : vector<8x8xf32>
    %47 = tpu.matmul %44, %45, %cst_14 {dimension_numbers = #tpu.dot_dimension_numbers<[1], [1], [0], [0], [0, 0, 1, 0], [], []>} : vector<8x32xbf16>, vector<8x32xbf16>, vector<8x8xf32> -> vector<8x8xf32>
    %cst_15 = arith.constant 0.176776692 : f32
    %48 = vector.broadcast %cst_15 : f32 to vector<8x8xf32>
    %49 = arith.mulf %47, %48 : vector<8x8xf32>
    %cst_16 = arith.constant dense<0xFF800000> : vector<8xf32>
    %50 = vector.multi_reduction <maximumf>, %49, %cst_16 [1] : vector<8x8xf32> to vector<8xf32>
    %51 = vector.shape_cast %50 : vector<8xf32> to vector<8x1xf32>
    %52 = vector.broadcast %51 : vector<8x1xf32> to vector<8x8xf32>
    %53 = arith.subf %49, %52 : vector<8x8xf32>
    %54 = math.exp %53 : vector<8x8xf32>
    %cst_17 = arith.constant dense<0.000000e+00> : vector<8xf32>
    %55 = vector.multi_reduction <add>, %54, %cst_17 [1] : vector<8x8xf32> to vector<8xf32>
    %56 = vector.shape_cast %55 : vector<8xf32> to vector<8x1xf32>
    %57 = tpu.reciprocal %56 {approx = true} : vector<8x1xf32> -> vector<8x1xf32>
    %58 = vector.broadcast %57 : vector<8x1xf32> to vector<8x8xf32>
    %59 = arith.mulf %54, %58 : vector<8x8xf32>
    %60 = arith.truncf %59 : vector<8x8xf32> to vector<8x8xbf16>
    %cst_18 = arith.constant dense<0.000000e+00> : vector<8x32xf32>
    %61 = tpu.matmul %60, %46, %cst_18 {dimension_numbers = #tpu.dot_dimension_numbers<[1], [0], [0], [1], [0, 0, 1, 1], [], []>} : vector<8x8xbf16>, vector<8x32xbf16>, vector<8x32xf32> -> vector<8x32xf32>
    %62 = arith.truncf %61 : vector<8x32xf32> to vector<8x32xbf16>
    %63 = vector.extract_strided_slice %1 {offsets = [0, 96], sizes = [8, 32], strides = [1, 1]} : vector<8x128xbf16> to vector<8x32xbf16>
    %64 = vector.extract_strided_slice %4 {offsets = [0, 96], sizes = [8, 32], strides = [1, 1]} : vector<8x128xbf16> to vector<8x32xbf16>
    %65 = vector.extract_strided_slice %5 {offsets = [0, 96], sizes = [8, 32], strides = [1, 1]} : vector<8x128xbf16> to vector<8x32xbf16>
    %cst_19 = arith.constant dense<0.000000e+00> : vector<8x8xf32>
    %66 = tpu.matmul %63, %64, %cst_19 {dimension_numbers = #tpu.dot_dimension_numbers<[1], [1], [0], [0], [0, 0, 1, 0], [], []>} : vector<8x32xbf16>, vector<8x32xbf16>, vector<8x8xf32> -> vector<8x8xf32>
    %cst_20 = arith.constant 0.176776692 : f32
    %67 = vector.broadcast %cst_20 : f32 to vector<8x8xf32>
    %68 = arith.mulf %66, %67 : vector<8x8xf32>
    %cst_21 = arith.constant dense<0xFF800000> : vector<8xf32>
    %69 = vector.multi_reduction <maximumf>, %68, %cst_21 [1] : vector<8x8xf32> to vector<8xf32>
    %70 = vector.shape_cast %69 : vector<8xf32> to vector<8x1xf32>
    %71 = vector.broadcast %70 : vector<8x1xf32> to vector<8x8xf32>
    %72 = arith.subf %68, %71 : vector<8x8xf32>
    %73 = math.exp %72 : vector<8x8xf32>
    %cst_22 = arith.constant dense<0.000000e+00> : vector<8xf32>
    %74 = vector.multi_reduction <add>, %73, %cst_22 [1] : vector<8x8xf32> to vector<8xf32>
    %75 = vector.shape_cast %74 : vector<8xf32> to vector<8x1xf32>
    %76 = tpu.reciprocal %75 {approx = true} : vector<8x1xf32> -> vector<8x1xf32>
    %77 = vector.broadcast %76 : vector<8x1xf32> to vector<8x8xf32>
    %78 = arith.mulf %73, %77 : vector<8x8xf32>
    %79 = arith.truncf %78 : vector<8x8xf32> to vector<8x8xbf16>
    %cst_23 = arith.constant dense<0.000000e+00> : vector<8x32xf32>
    %80 = tpu.matmul %79, %65, %cst_23 {dimension_numbers = #tpu.dot_dimension_numbers<[1], [0], [0], [1], [0, 0, 1, 1], [], []>} : vector<8x8xbf16>, vector<8x32xbf16>, vector<8x32xf32> -> vector<8x32xf32>
    %81 = arith.truncf %80 : vector<8x32xf32> to vector<8x32xbf16>
    %82 = tpu.concatenate %24, %43, %62, %81 in 1 : vector<8x32xbf16>, vector<8x32xbf16>, vector<8x32xbf16>, vector<8x32xbf16> -> vector<8x128xbf16>
    %c0_24 = arith.constant 0 : index
    %c0_25 = arith.constant 0 : index
    %83 = vector.load %arg5[%c0_24, %c0_25] : memref<128x128xbf16, #tpu.memory_space<vmem>>, vector<128x128xbf16>
    %cst_26 = arith.constant dense<0.000000e+00> : vector<8x128xf32>
    %84 = tpu.matmul %82, %83, %cst_26 {dimension_numbers = #tpu.dot_dimension_numbers<[1], [0], [0], [1], [0, 0, 1, 1], [], []>} : vector<8x128xbf16>, vector<128x128xbf16>, vector<8x128xf32> -> vector<8x128xf32>
    %c0_27 = arith.constant 0 : index
    %c0_28 = arith.constant 0 : index
    %85 = vector.load %arg6[%c0_27, %c0_28] : memref<1x128xf32, #tpu.memory_space<vmem>>, vector<1x128xf32>
    %86 = vector.broadcast %85 : vector<1x128xf32> to vector<8x128xf32>
    %87 = arith.addf %84, %86 : vector<8x128xf32>
    %c0_29 = arith.constant 0 : index
    %c0_30 = arith.constant 0 : index
    %c0_31 = arith.constant 0 : index
    %88 = vector.load %arg4[%c0_29, %c0_30, %c0_31] : memref<1x8x128xf32, #tpu.memory_space<vmem>>, vector<1x8x128xf32>
    %89 = vector.shape_cast %88 : vector<1x8x128xf32> to vector<8x128xf32>
    %90 = arith.addf %89, %87 : vector<8x128xf32>
    %cst_32 = arith.constant dense<0.000000e+00> : vector<8xf32>
    %91 = vector.multi_reduction <add>, %90, %cst_32 [1] : vector<8x128xf32> to vector<8xf32>
    %92 = vector.shape_cast %91 : vector<8xf32> to vector<8x1xf32>
    %cst_33 = arith.constant 1.280000e+02 : f32
    %93 = vector.broadcast %cst_33 : f32 to vector<8x1xf32>
    %94 = arith.divf %92, %93 : vector<8x1xf32>
    %95 = vector.broadcast %94 : vector<8x1xf32> to vector<8x128xf32>
    %96 = arith.subf %90, %95 : vector<8x128xf32>
    %97 = arith.mulf %96, %96 : vector<8x128xf32>
    %cst_34 = arith.constant dense<0.000000e+00> : vector<8xf32>
    %98 = vector.multi_reduction <add>, %97, %cst_34 [1] : vector<8x128xf32> to vector<8xf32>
    %99 = vector.shape_cast %98 : vector<8xf32> to vector<8x1xf32>
    %cst_35 = arith.constant 1.280000e+02 : f32
    %100 = vector.broadcast %cst_35 : f32 to vector<8x1xf32>
    %101 = arith.divf %99, %100 : vector<8x1xf32>
    %102 = vector.broadcast %94 : vector<8x1xf32> to vector<8x128xf32>
    %103 = arith.subf %90, %102 : vector<8x128xf32>
    %cst_36 = arith.constant 9.99999974E-6 : f32
    %104 = vector.broadcast %cst_36 : f32 to vector<8x1xf32>
    %105 = arith.addf %101, %104 : vector<8x1xf32>
    %106 = math.rsqrt %105 : vector<8x1xf32>
    %107 = vector.broadcast %106 : vector<8x1xf32> to vector<8x128xf32>
    %108 = arith.mulf %103, %107 : vector<8x128xf32>
    %c0_37 = arith.constant 0 : index
    %c0_38 = arith.constant 0 : index
    %109 = vector.load %arg7[%c0_37, %c0_38] : memref<1x128xf32, #tpu.memory_space<vmem>>, vector<1x128xf32>
    %110 = vector.broadcast %109 : vector<1x128xf32> to vector<8x128xf32>
    %111 = arith.mulf %108, %110 : vector<8x128xf32>
    %c0_39 = arith.constant 0 : index
    %c0_40 = arith.constant 0 : index
    %112 = vector.load %arg8[%c0_39, %c0_40] : memref<1x128xf32, #tpu.memory_space<vmem>>, vector<1x128xf32>
    %113 = vector.broadcast %112 : vector<1x128xf32> to vector<8x128xf32>
    %114 = arith.addf %111, %113 : vector<8x128xf32>
    %c0_41 = arith.constant 0 : index
    %c0_42 = arith.constant 0 : index
    %c0_43 = arith.constant 0 : index
    %115 = vector.load %arg9[%c0_41, %c0_42, %c0_43] : memref<1x8x128xf32, #tpu.memory_space<vmem>>, vector<1x8x128xf32>
    %116 = vector.shape_cast %115 : vector<1x8x128xf32> to vector<8x128xf32>
    %117 = vector.shape_cast %114 : vector<8x128xf32> to vector<1x8x128xf32>
    tpu.vector_store %arg9[%c0_41, %c0_42, %c0_43], %117 {strides = array<i32>} : memref<1x8x128xf32, #tpu.memory_space<vmem>>, vector<1x8x128xf32>,
    return
  }
  func.func @transform_0(%arg0: i32, %arg1: i32) -> (i32, i32, i32) {
    %c0_i32 = arith.constant 0 : i32
    %c0_i32_0 = arith.constant 0 : i32
    return %arg0, %arg1, %c0_i32 : i32, i32, i32
  }
  func.func @transform_1(%arg0: i32, %arg1: i32) -> (i32, i32, i32) {
    %c0_i32 = arith.constant 0 : i32
    %c0_i32_0 = arith.constant 0 : i32
    %c0_i32_1 = arith.constant 0 : i32
    return %arg0, %c0_i32, %c0_i32_0 : i32, i32, i32
  }
  func.func @transform_2(%arg0: i32, %arg1: i32) -> (i32, i32, i32) {
    %c0_i32 = arith.constant 0 : i32
    %c0_i32_0 = arith.constant 0 : i32
    return %arg0, %arg1, %c0_i32 : i32, i32, i32
  }
  func.func @transform_3(%arg0: i32, %arg1: i32) -> (i32, i32) {
    %c0_i32 = arith.constant 0 : i32
    %c0_i32_0 = arith.constant 0 : i32
    %c0_i32_1 = arith.constant 0 : i32
    return %c0_i32, %c0_i32_0 : i32, i32
  }
  func.func @transform_4(%arg0: i32, %arg1: i32) -> (i32, i32) {
    %c0_i32 = arith.constant 0 : i32
    %c0_i32_0 = arith.constant 0 : i32
    %c0_i32_1 = arith.constant 0 : i32
    return %c0_i32, %c0_i32_0 : i32, i32
  }
  func.func @transform_5(%arg0: i32, %arg1: i32) -> (i32, i32) {
    %c0_i32 = arith.constant 0 : i32
    %c0_i32_0 = arith.constant 0 : i32
    %c0_i32_1 = arith.constant 0 : i32
    return %c0_i32, %c0_i32_0 : i32, i32
  }
  func.func @transform_6(%arg0: i32, %arg1: i32) -> (i32, i32) {
    %c0_i32 = arith.constant 0 : i32
    %c0_i32_0 = arith.constant 0 : i32
    %c0_i32_1 = arith.constant 0 : i32
    return %c0_i32, %c0_i32_0 : i32, i32
  }
  func.func @transform_7(%arg0: i32, %arg1: i32) -> (i32, i32, i32) {
    %c0_i32 = arith.constant 0 : i32
    %c0_i32_0 = arith.constant 0 : i32
    return %arg0, %arg1, %c0_i32 : i32, i32, i32
  }
}

module attributes {stable_mosaic.version = 11 : i64} {
  func.func @_selfattn_proj_kernel(%arg0: i32, %arg1: memref<16x128xf32, #tpu.memory_space<vmem>>, %arg2: memref<16x128xf32, #tpu.memory_space<vmem>>, %arg3: memref<128x256xbf16, #tpu.memory_space<vmem>>, %arg4: memref<1x256xf32, #tpu.memory_space<vmem>>, %arg5: memref<128x128xbf16, #tpu.memory_space<vmem>>, %arg6: memref<1x128xf32, #tpu.memory_space<vmem>>, %arg7: memref<16x128xbf16, #tpu.memory_space<vmem>>, %arg8: memref<16x256xbf16, #tpu.memory_space<vmem>>) attributes {dimension_semantics = [#tpu.dimension_semantics<parallel>], iteration_bounds = array<i64: 1>, scalar_prefetch = 0 : i64, scratch_operands = 0 : i64, tpu.core_type = #tpu.core_type<tc>, window_params = [{transform_indices = @transform_0, window_bounds = array<i64: 16, 128>}, {transform_indices = @transform_1, window_bounds = array<i64: 16, 128>}, {pipeline_mode = #tpu.pipeline_mode<synchronous>, transform_indices = @transform_2, window_bounds = array<i64: 128, 256>}, {pipeline_mode = #tpu.pipeline_mode<synchronous>, transform_indices = @transform_3, window_bounds = array<i64: 1, 256>}, {pipeline_mode = #tpu.pipeline_mode<synchronous>, transform_indices = @transform_4, window_bounds = array<i64: 128, 128>}, {pipeline_mode = #tpu.pipeline_mode<synchronous>, transform_indices = @transform_5, window_bounds = array<i64: 1, 128>}, {transform_indices = @transform_6, window_bounds = array<i64: 16, 128>}, {transform_indices = @transform_7, window_bounds = array<i64: 16, 256>}]} {
    %c0 = arith.constant 0 : index
    %c0_0 = arith.constant 0 : index
    %0 = vector.load %arg1[%c0, %c0_0] : memref<16x128xf32, #tpu.memory_space<vmem>>, vector<16x128xf32>
    %c0_1 = arith.constant 0 : index
    %c0_2 = arith.constant 0 : index
    %1 = vector.load %arg2[%c0_1, %c0_2] : memref<16x128xf32, #tpu.memory_space<vmem>>, vector<16x128xf32>
    %2 = arith.addf %0, %1 : vector<16x128xf32>
    %3 = arith.truncf %2 : vector<16x128xf32> to vector<16x128xbf16>
    %c0_3 = arith.constant 0 : index
    %c0_4 = arith.constant 0 : index
    %4 = vector.load %arg3[%c0_3, %c0_4] : memref<128x256xbf16, #tpu.memory_space<vmem>>, vector<128x256xbf16>
    %cst = arith.constant dense<0.000000e+00> : vector<16x256xf32>
    %5 = tpu.matmul %3, %4, %cst {dimension_numbers = #tpu.dot_dimension_numbers<[1], [0], [0], [1], [0, 0, 1, 1], [], []>} : vector<16x128xbf16>, vector<128x256xbf16>, vector<16x256xf32> -> vector<16x256xf32>
    %c0_5 = arith.constant 0 : index
    %c0_6 = arith.constant 0 : index
    %6 = vector.load %arg4[%c0_5, %c0_6] : memref<1x256xf32, #tpu.memory_space<vmem>>, vector<1x256xf32>
    %7 = vector.broadcast %6 : vector<1x256xf32> to vector<16x256xf32>
    %8 = arith.addf %5, %7 : vector<16x256xf32>
    %9 = arith.truncf %0 : vector<16x128xf32> to vector<16x128xbf16>
    %c0_7 = arith.constant 0 : index
    %c0_8 = arith.constant 0 : index
    %10 = vector.load %arg5[%c0_7, %c0_8] : memref<128x128xbf16, #tpu.memory_space<vmem>>, vector<128x128xbf16>
    %cst_9 = arith.constant dense<0.000000e+00> : vector<16x128xf32>
    %11 = tpu.matmul %9, %10, %cst_9 {dimension_numbers = #tpu.dot_dimension_numbers<[1], [0], [0], [1], [0, 0, 1, 1], [], []>} : vector<16x128xbf16>, vector<128x128xbf16>, vector<16x128xf32> -> vector<16x128xf32>
    %c0_10 = arith.constant 0 : index
    %c0_11 = arith.constant 0 : index
    %12 = vector.load %arg6[%c0_10, %c0_11] : memref<1x128xf32, #tpu.memory_space<vmem>>, vector<1x128xf32>
    %13 = vector.broadcast %12 : vector<1x128xf32> to vector<16x128xf32>
    %14 = arith.addf %11, %13 : vector<16x128xf32>
    %15 = vector.extract_strided_slice %8 {offsets = [0, 0], sizes = [16, 128], strides = [1, 1]} : vector<16x256xf32> to vector<16x128xf32>
    %16 = arith.truncf %15 : vector<16x128xf32> to vector<16x128xbf16>
    %c0_12 = arith.constant 0 : index
    %c0_13 = arith.constant 0 : index
    %17 = vector.load %arg7[%c0_12, %c0_13] : memref<16x128xbf16, #tpu.memory_space<vmem>>, vector<16x128xbf16>
    tpu.vector_store %arg7[%c0_12, %c0_13], %16 {strides = array<i32>} : memref<16x128xbf16, #tpu.memory_space<vmem>>, vector<16x128xbf16>,
    %18 = vector.extract_strided_slice %8 {offsets = [0, 128], sizes = [16, 128], strides = [1, 1]} : vector<16x256xf32> to vector<16x128xf32>
    %19 = tpu.concatenate %18, %14 in 1 : vector<16x128xf32>, vector<16x128xf32> -> vector<16x256xf32>
    %20 = arith.truncf %19 : vector<16x256xf32> to vector<16x256xbf16>
    %c0_14 = arith.constant 0 : index
    %c0_15 = arith.constant 0 : index
    %21 = vector.load %arg8[%c0_14, %c0_15] : memref<16x256xbf16, #tpu.memory_space<vmem>>, vector<16x256xbf16>
    tpu.vector_store %arg8[%c0_14, %c0_15], %20 {strides = array<i32>} : memref<16x256xbf16, #tpu.memory_space<vmem>>, vector<16x256xbf16>,
    return
  }
  func.func @transform_0(%arg0: i32) -> (i32, i32) {
    %c0_i32 = arith.constant 0 : i32
    %c0_i32_0 = arith.constant 0 : i32
    return %arg0, %c0_i32 : i32, i32
  }
  func.func @transform_1(%arg0: i32) -> (i32, i32) {
    %c0_i32 = arith.constant 0 : i32
    %c0_i32_0 = arith.constant 0 : i32
    return %arg0, %c0_i32 : i32, i32
  }
  func.func @transform_2(%arg0: i32) -> (i32, i32) {
    %c0_i32 = arith.constant 0 : i32
    %c0_i32_0 = arith.constant 0 : i32
    %c0_i32_1 = arith.constant 0 : i32
    return %c0_i32, %c0_i32_0 : i32, i32
  }
  func.func @transform_3(%arg0: i32) -> (i32, i32) {
    %c0_i32 = arith.constant 0 : i32
    %c0_i32_0 = arith.constant 0 : i32
    %c0_i32_1 = arith.constant 0 : i32
    return %c0_i32, %c0_i32_0 : i32, i32
  }
  func.func @transform_4(%arg0: i32) -> (i32, i32) {
    %c0_i32 = arith.constant 0 : i32
    %c0_i32_0 = arith.constant 0 : i32
    %c0_i32_1 = arith.constant 0 : i32
    return %c0_i32, %c0_i32_0 : i32, i32
  }
  func.func @transform_5(%arg0: i32) -> (i32, i32) {
    %c0_i32 = arith.constant 0 : i32
    %c0_i32_0 = arith.constant 0 : i32
    %c0_i32_1 = arith.constant 0 : i32
    return %c0_i32, %c0_i32_0 : i32, i32
  }
  func.func @transform_6(%arg0: i32) -> (i32, i32) {
    %c0_i32 = arith.constant 0 : i32
    %c0_i32_0 = arith.constant 0 : i32
    return %arg0, %c0_i32 : i32, i32
  }
  func.func @transform_7(%arg0: i32) -> (i32, i32) {
    %c0_i32 = arith.constant 0 : i32
    %c0_i32_0 = arith.constant 0 : i32
    return %arg0, %c0_i32 : i32, i32
  }
}

module attributes {stable_mosaic.version = 11 : i64} {
  func.func @_linear_kernel(%arg0: i32, %arg1: memref<16x128xf32, #tpu.memory_space<vmem>>, %arg2: memref<16x128xf32, #tpu.memory_space<vmem>>, %arg3: memref<128x128xbf16, #tpu.memory_space<vmem>>, %arg4: memref<1x128xf32, #tpu.memory_space<vmem>>, %arg5: memref<16x128xbf16, #tpu.memory_space<vmem>>) attributes {dimension_semantics = [#tpu.dimension_semantics<parallel>], iteration_bounds = array<i64: 1>, scalar_prefetch = 0 : i64, scratch_operands = 0 : i64, tpu.core_type = #tpu.core_type<tc>, window_params = [{transform_indices = @transform_0, window_bounds = array<i64: 16, 128>}, {transform_indices = @transform_1, window_bounds = array<i64: 16, 128>}, {pipeline_mode = #tpu.pipeline_mode<synchronous>, transform_indices = @transform_2, window_bounds = array<i64: 128, 128>}, {pipeline_mode = #tpu.pipeline_mode<synchronous>, transform_indices = @transform_3, window_bounds = array<i64: 1, 128>}, {transform_indices = @transform_4, window_bounds = array<i64: 16, 128>}]} {
    %c0 = arith.constant 0 : index
    %c0_0 = arith.constant 0 : index
    %0 = vector.load %arg1[%c0, %c0_0] : memref<16x128xf32, #tpu.memory_space<vmem>>, vector<16x128xf32>
    %c0_1 = arith.constant 0 : index
    %c0_2 = arith.constant 0 : index
    %1 = vector.load %arg2[%c0_1, %c0_2] : memref<16x128xf32, #tpu.memory_space<vmem>>, vector<16x128xf32>
    %2 = arith.addf %0, %1 : vector<16x128xf32>
    %3 = arith.truncf %2 : vector<16x128xf32> to vector<16x128xbf16>
    %c0_3 = arith.constant 0 : index
    %c0_4 = arith.constant 0 : index
    %4 = vector.load %arg3[%c0_3, %c0_4] : memref<128x128xbf16, #tpu.memory_space<vmem>>, vector<128x128xbf16>
    %cst = arith.constant dense<0.000000e+00> : vector<16x128xf32>
    %5 = tpu.matmul %3, %4, %cst {dimension_numbers = #tpu.dot_dimension_numbers<[1], [0], [0], [1], [0, 0, 1, 1], [], []>} : vector<16x128xbf16>, vector<128x128xbf16>, vector<16x128xf32> -> vector<16x128xf32>
    %c0_5 = arith.constant 0 : index
    %c0_6 = arith.constant 0 : index
    %6 = vector.load %arg4[%c0_5, %c0_6] : memref<1x128xf32, #tpu.memory_space<vmem>>, vector<1x128xf32>
    %7 = vector.broadcast %6 : vector<1x128xf32> to vector<16x128xf32>
    %8 = arith.addf %5, %7 : vector<16x128xf32>
    %9 = arith.truncf %8 : vector<16x128xf32> to vector<16x128xbf16>
    %c0_7 = arith.constant 0 : index
    %c0_8 = arith.constant 0 : index
    %10 = vector.load %arg5[%c0_7, %c0_8] : memref<16x128xbf16, #tpu.memory_space<vmem>>, vector<16x128xbf16>
    tpu.vector_store %arg5[%c0_7, %c0_8], %9 {strides = array<i32>} : memref<16x128xbf16, #tpu.memory_space<vmem>>, vector<16x128xbf16>,
    return
  }
  func.func @transform_0(%arg0: i32) -> (i32, i32) {
    %c0_i32 = arith.constant 0 : i32
    %c0_i32_0 = arith.constant 0 : i32
    return %arg0, %c0_i32 : i32, i32
  }
  func.func @transform_1(%arg0: i32) -> (i32, i32) {
    %c0_i32 = arith.constant 0 : i32
    %c0_i32_0 = arith.constant 0 : i32
    return %arg0, %c0_i32 : i32, i32
  }
  func.func @transform_2(%arg0: i32) -> (i32, i32) {
    %c0_i32 = arith.constant 0 : i32
    %c0_i32_0 = arith.constant 0 : i32
    %c0_i32_1 = arith.constant 0 : i32
    return %c0_i32, %c0_i32_0 : i32, i32
  }
  func.func @transform_3(%arg0: i32) -> (i32, i32) {
    %c0_i32 = arith.constant 0 : i32
    %c0_i32_0 = arith.constant 0 : i32
    %c0_i32_1 = arith.constant 0 : i32
    return %c0_i32, %c0_i32_0 : i32, i32
  }
  func.func @transform_4(%arg0: i32) -> (i32, i32) {
    %c0_i32 = arith.constant 0 : i32
    %c0_i32_0 = arith.constant 0 : i32
    return %arg0, %c0_i32 : i32, i32
  }
}

module attributes {stable_mosaic.version = 11 : i64} {
  func.func @_linear_kernel(%arg0: i32, %arg1: memref<32x128xf32, #tpu.memory_space<vmem>>, %arg2: memref<128x256xbf16, #tpu.memory_space<vmem>>, %arg3: memref<1x256xf32, #tpu.memory_space<vmem>>, %arg4: memref<32x256xbf16, #tpu.memory_space<vmem>>) attributes {dimension_semantics = [#tpu.dimension_semantics<parallel>], iteration_bounds = array<i64: 1>, scalar_prefetch = 0 : i64, scratch_operands = 0 : i64, tpu.core_type = #tpu.core_type<tc>, window_params = [{transform_indices = @transform_0, window_bounds = array<i64: 32, 128>}, {pipeline_mode = #tpu.pipeline_mode<synchronous>, transform_indices = @transform_1, window_bounds = array<i64: 128, 256>}, {pipeline_mode = #tpu.pipeline_mode<synchronous>, transform_indices = @transform_2, window_bounds = array<i64: 1, 256>}, {transform_indices = @transform_3, window_bounds = array<i64: 32, 256>}]} {
    %c0 = arith.constant 0 : index
    %c0_0 = arith.constant 0 : index
    %0 = vector.load %arg1[%c0, %c0_0] : memref<32x128xf32, #tpu.memory_space<vmem>>, vector<32x128xf32>
    %1 = arith.truncf %0 : vector<32x128xf32> to vector<32x128xbf16>
    %c0_1 = arith.constant 0 : index
    %c0_2 = arith.constant 0 : index
    %2 = vector.load %arg2[%c0_1, %c0_2] : memref<128x256xbf16, #tpu.memory_space<vmem>>, vector<128x256xbf16>
    %cst = arith.constant dense<0.000000e+00> : vector<32x256xf32>
    %3 = tpu.matmul %1, %2, %cst {dimension_numbers = #tpu.dot_dimension_numbers<[1], [0], [0], [1], [0, 0, 1, 1], [], []>} : vector<32x128xbf16>, vector<128x256xbf16>, vector<32x256xf32> -> vector<32x256xf32>
    %c0_3 = arith.constant 0 : index
    %c0_4 = arith.constant 0 : index
    %4 = vector.load %arg3[%c0_3, %c0_4] : memref<1x256xf32, #tpu.memory_space<vmem>>, vector<1x256xf32>
    %5 = vector.broadcast %4 : vector<1x256xf32> to vector<32x256xf32>
    %6 = arith.addf %3, %5 : vector<32x256xf32>
    %7 = arith.truncf %6 : vector<32x256xf32> to vector<32x256xbf16>
    %c0_5 = arith.constant 0 : index
    %c0_6 = arith.constant 0 : index
    %8 = vector.load %arg4[%c0_5, %c0_6] : memref<32x256xbf16, #tpu.memory_space<vmem>>, vector<32x256xbf16>
    tpu.vector_store %arg4[%c0_5, %c0_6], %7 {strides = array<i32>} : memref<32x256xbf16, #tpu.memory_space<vmem>>, vector<32x256xbf16>,
    return
  }
  func.func @transform_0(%arg0: i32) -> (i32, i32) {
    %c0_i32 = arith.constant 0 : i32
    %c0_i32_0 = arith.constant 0 : i32
    return %arg0, %c0_i32 : i32, i32
  }
  func.func @transform_1(%arg0: i32) -> (i32, i32) {
    %c0_i32 = arith.constant 0 : i32
    %c0_i32_0 = arith.constant 0 : i32
    %c0_i32_1 = arith.constant 0 : i32
    return %c0_i32, %c0_i32_0 : i32, i32
  }
  func.func @transform_2(%arg0: i32) -> (i32, i32) {
    %c0_i32 = arith.constant 0 : i32
    %c0_i32_0 = arith.constant 0 : i32
    %c0_i32_1 = arith.constant 0 : i32
    return %c0_i32, %c0_i32_0 : i32, i32
  }
  func.func @transform_3(%arg0: i32) -> (i32, i32) {
    %c0_i32 = arith.constant 0 : i32
    %c0_i32_0 = arith.constant 0 : i32
    return %arg0, %c0_i32 : i32, i32
  }
}

module attributes {stable_mosaic.version = 11 : i64} {
  func.func @_attn_block_kernel(%arg0: i32, %arg1: i32, %arg2: memref<1x8x128xbf16, #tpu.memory_space<vmem>>, %arg3: memref<1x16x256xbf16, #tpu.memory_space<vmem>>, %arg4: memref<1x1x16xf32, #tpu.memory_space<vmem>>, %arg5: memref<1x8x128xf32, #tpu.memory_space<vmem>>, %arg6: memref<128x128xbf16, #tpu.memory_space<vmem>>, %arg7: memref<1x128xf32, #tpu.memory_space<vmem>>, %arg8: memref<1x128xf32, #tpu.memory_space<vmem>>, %arg9: memref<1x128xf32, #tpu.memory_space<vmem>>, %arg10: memref<1x8x128xf32, #tpu.memory_space<vmem>>) attributes {dimension_semantics = [#tpu.dimension_semantics<parallel>, #tpu.dimension_semantics<parallel>], iteration_bounds = array<i64: 2, 1>, scalar_prefetch = 0 : i64, scratch_operands = 0 : i64, tpu.core_type = #tpu.core_type<tc>, window_params = [{transform_indices = @transform_0, window_bounds = array<i64: 1, 8, 128>}, {transform_indices = @transform_1, window_bounds = array<i64: 1, 16, 256>}, {transform_indices = @transform_2, window_bounds = array<i64: 1, 1, 16>}, {transform_indices = @transform_3, window_bounds = array<i64: 1, 8, 128>}, {pipeline_mode = #tpu.pipeline_mode<synchronous>, transform_indices = @transform_4, window_bounds = array<i64: 128, 128>}, {pipeline_mode = #tpu.pipeline_mode<synchronous>, transform_indices = @transform_5, window_bounds = array<i64: 1, 128>}, {pipeline_mode = #tpu.pipeline_mode<synchronous>, transform_indices = @transform_6, window_bounds = array<i64: 1, 128>}, {pipeline_mode = #tpu.pipeline_mode<synchronous>, transform_indices = @transform_7, window_bounds = array<i64: 1, 128>}, {transform_indices = @transform_8, window_bounds = array<i64: 1, 8, 128>}]} {
    %c0 = arith.constant 0 : index
    %c0_0 = arith.constant 0 : index
    %c0_1 = arith.constant 0 : index
    %0 = vector.load %arg2[%c0, %c0_0, %c0_1] : memref<1x8x128xbf16, #tpu.memory_space<vmem>>, vector<1x8x128xbf16>
    %1 = vector.shape_cast %0 : vector<1x8x128xbf16> to vector<8x128xbf16>
    %c0_2 = arith.constant 0 : index
    %c0_3 = arith.constant 0 : index
    %c0_4 = arith.constant 0 : index
    %2 = vector.load %arg3[%c0_2, %c0_3, %c0_4] : memref<1x16x256xbf16, #tpu.memory_space<vmem>>, vector<1x16x256xbf16>
    %3 = vector.shape_cast %2 : vector<1x16x256xbf16> to vector<16x256xbf16>
    %4 = vector.extract_strided_slice %3 {offsets = [0, 0], sizes = [16, 128], strides = [1, 1]} : vector<16x256xbf16> to vector<16x128xbf16>
    %5 = vector.extract_strided_slice %3 {offsets = [0, 128], sizes = [16, 128], strides = [1, 1]} : vector<16x256xbf16> to vector<16x128xbf16>
    %c0_5 = arith.constant 0 : index
    %c0_6 = arith.constant 0 : index
    %c0_7 = arith.constant 0 : index
    %6 = vector.load %arg4[%c0_5, %c0_6, %c0_7] : memref<1x1x16xf32, #tpu.memory_space<vmem>>, vector<1x1x16xf32>
    %7 = vector.shape_cast %6 : vector<1x1x16xf32> to vector<1x16xf32>
    %8 = vector.extract_strided_slice %1 {offsets = [0, 0], sizes = [8, 32], strides = [1, 1]} : vector<8x128xbf16> to vector<8x32xbf16>
    %9 = vector.extract_strided_slice %4 {offsets = [0, 0], sizes = [16, 32], strides = [1, 1]} : vector<16x128xbf16> to vector<16x32xbf16>
    %10 = vector.extract_strided_slice %5 {offsets = [0, 0], sizes = [16, 32], strides = [1, 1]} : vector<16x128xbf16> to vector<16x32xbf16>
    %cst = arith.constant dense<0.000000e+00> : vector<8x16xf32>
    %11 = tpu.matmul %8, %9, %cst {dimension_numbers = #tpu.dot_dimension_numbers<[1], [1], [0], [0], [0, 0, 1, 0], [], []>} : vector<8x32xbf16>, vector<16x32xbf16>, vector<8x16xf32> -> vector<8x16xf32>
    %cst_8 = arith.constant 0.176776692 : f32
    %12 = vector.broadcast %cst_8 : f32 to vector<8x16xf32>
    %13 = arith.mulf %11, %12 : vector<8x16xf32>
    %14 = vector.broadcast %7 : vector<1x16xf32> to vector<8x16xf32>
    %15 = arith.addf %13, %14 : vector<8x16xf32>
    %cst_9 = arith.constant dense<0xFF800000> : vector<8xf32>
    %16 = vector.multi_reduction <maximumf>, %15, %cst_9 [1] : vector<8x16xf32> to vector<8xf32>
    %17 = vector.shape_cast %16 : vector<8xf32> to vector<8x1xf32>
    %18 = vector.broadcast %17 : vector<8x1xf32> to vector<8x16xf32>
    %19 = arith.subf %15, %18 : vector<8x16xf32>
    %20 = math.exp %19 : vector<8x16xf32>
    %cst_10 = arith.constant dense<0.000000e+00> : vector<8xf32>
    %21 = vector.multi_reduction <add>, %20, %cst_10 [1] : vector<8x16xf32> to vector<8xf32>
    %22 = vector.shape_cast %21 : vector<8xf32> to vector<8x1xf32>
    %23 = tpu.reciprocal %22 {approx = true} : vector<8x1xf32> -> vector<8x1xf32>
    %24 = vector.broadcast %23 : vector<8x1xf32> to vector<8x16xf32>
    %25 = arith.mulf %20, %24 : vector<8x16xf32>
    %26 = arith.truncf %25 : vector<8x16xf32> to vector<8x16xbf16>
    %cst_11 = arith.constant dense<0.000000e+00> : vector<8x32xf32>
    %27 = tpu.matmul %26, %10, %cst_11 {dimension_numbers = #tpu.dot_dimension_numbers<[1], [0], [0], [1], [0, 0, 1, 1], [], []>} : vector<8x16xbf16>, vector<16x32xbf16>, vector<8x32xf32> -> vector<8x32xf32>
    %28 = arith.truncf %27 : vector<8x32xf32> to vector<8x32xbf16>
    %29 = vector.extract_strided_slice %1 {offsets = [0, 32], sizes = [8, 32], strides = [1, 1]} : vector<8x128xbf16> to vector<8x32xbf16>
    %30 = vector.extract_strided_slice %4 {offsets = [0, 32], sizes = [16, 32], strides = [1, 1]} : vector<16x128xbf16> to vector<16x32xbf16>
    %31 = vector.extract_strided_slice %5 {offsets = [0, 32], sizes = [16, 32], strides = [1, 1]} : vector<16x128xbf16> to vector<16x32xbf16>
    %cst_12 = arith.constant dense<0.000000e+00> : vector<8x16xf32>
    %32 = tpu.matmul %29, %30, %cst_12 {dimension_numbers = #tpu.dot_dimension_numbers<[1], [1], [0], [0], [0, 0, 1, 0], [], []>} : vector<8x32xbf16>, vector<16x32xbf16>, vector<8x16xf32> -> vector<8x16xf32>
    %cst_13 = arith.constant 0.176776692 : f32
    %33 = vector.broadcast %cst_13 : f32 to vector<8x16xf32>
    %34 = arith.mulf %32, %33 : vector<8x16xf32>
    %35 = vector.broadcast %7 : vector<1x16xf32> to vector<8x16xf32>
    %36 = arith.addf %34, %35 : vector<8x16xf32>
    %cst_14 = arith.constant dense<0xFF800000> : vector<8xf32>
    %37 = vector.multi_reduction <maximumf>, %36, %cst_14 [1] : vector<8x16xf32> to vector<8xf32>
    %38 = vector.shape_cast %37 : vector<8xf32> to vector<8x1xf32>
    %39 = vector.broadcast %38 : vector<8x1xf32> to vector<8x16xf32>
    %40 = arith.subf %36, %39 : vector<8x16xf32>
    %41 = math.exp %40 : vector<8x16xf32>
    %cst_15 = arith.constant dense<0.000000e+00> : vector<8xf32>
    %42 = vector.multi_reduction <add>, %41, %cst_15 [1] : vector<8x16xf32> to vector<8xf32>
    %43 = vector.shape_cast %42 : vector<8xf32> to vector<8x1xf32>
    %44 = tpu.reciprocal %43 {approx = true} : vector<8x1xf32> -> vector<8x1xf32>
    %45 = vector.broadcast %44 : vector<8x1xf32> to vector<8x16xf32>
    %46 = arith.mulf %41, %45 : vector<8x16xf32>
    %47 = arith.truncf %46 : vector<8x16xf32> to vector<8x16xbf16>
    %cst_16 = arith.constant dense<0.000000e+00> : vector<8x32xf32>
    %48 = tpu.matmul %47, %31, %cst_16 {dimension_numbers = #tpu.dot_dimension_numbers<[1], [0], [0], [1], [0, 0, 1, 1], [], []>} : vector<8x16xbf16>, vector<16x32xbf16>, vector<8x32xf32> -> vector<8x32xf32>
    %49 = arith.truncf %48 : vector<8x32xf32> to vector<8x32xbf16>
    %50 = vector.extract_strided_slice %1 {offsets = [0, 64], sizes = [8, 32], strides = [1, 1]} : vector<8x128xbf16> to vector<8x32xbf16>
    %51 = vector.extract_strided_slice %4 {offsets = [0, 64], sizes = [16, 32], strides = [1, 1]} : vector<16x128xbf16> to vector<16x32xbf16>
    %52 = vector.extract_strided_slice %5 {offsets = [0, 64], sizes = [16, 32], strides = [1, 1]} : vector<16x128xbf16> to vector<16x32xbf16>
    %cst_17 = arith.constant dense<0.000000e+00> : vector<8x16xf32>
    %53 = tpu.matmul %50, %51, %cst_17 {dimension_numbers = #tpu.dot_dimension_numbers<[1], [1], [0], [0], [0, 0, 1, 0], [], []>} : vector<8x32xbf16>, vector<16x32xbf16>, vector<8x16xf32> -> vector<8x16xf32>
    %cst_18 = arith.constant 0.176776692 : f32
    %54 = vector.broadcast %cst_18 : f32 to vector<8x16xf32>
    %55 = arith.mulf %53, %54 : vector<8x16xf32>
    %56 = vector.broadcast %7 : vector<1x16xf32> to vector<8x16xf32>
    %57 = arith.addf %55, %56 : vector<8x16xf32>
    %cst_19 = arith.constant dense<0xFF800000> : vector<8xf32>
    %58 = vector.multi_reduction <maximumf>, %57, %cst_19 [1] : vector<8x16xf32> to vector<8xf32>
    %59 = vector.shape_cast %58 : vector<8xf32> to vector<8x1xf32>
    %60 = vector.broadcast %59 : vector<8x1xf32> to vector<8x16xf32>
    %61 = arith.subf %57, %60 : vector<8x16xf32>
    %62 = math.exp %61 : vector<8x16xf32>
    %cst_20 = arith.constant dense<0.000000e+00> : vector<8xf32>
    %63 = vector.multi_reduction <add>, %62, %cst_20 [1] : vector<8x16xf32> to vector<8xf32>
    %64 = vector.shape_cast %63 : vector<8xf32> to vector<8x1xf32>
    %65 = tpu.reciprocal %64 {approx = true} : vector<8x1xf32> -> vector<8x1xf32>
    %66 = vector.broadcast %65 : vector<8x1xf32> to vector<8x16xf32>
    %67 = arith.mulf %62, %66 : vector<8x16xf32>
    %68 = arith.truncf %67 : vector<8x16xf32> to vector<8x16xbf16>
    %cst_21 = arith.constant dense<0.000000e+00> : vector<8x32xf32>
    %69 = tpu.matmul %68, %52, %cst_21 {dimension_numbers = #tpu.dot_dimension_numbers<[1], [0], [0], [1], [0, 0, 1, 1], [], []>} : vector<8x16xbf16>, vector<16x32xbf16>, vector<8x32xf32> -> vector<8x32xf32>
    %70 = arith.truncf %69 : vector<8x32xf32> to vector<8x32xbf16>
    %71 = vector.extract_strided_slice %1 {offsets = [0, 96], sizes = [8, 32], strides = [1, 1]} : vector<8x128xbf16> to vector<8x32xbf16>
    %72 = vector.extract_strided_slice %4 {offsets = [0, 96], sizes = [16, 32], strides = [1, 1]} : vector<16x128xbf16> to vector<16x32xbf16>
    %73 = vector.extract_strided_slice %5 {offsets = [0, 96], sizes = [16, 32], strides = [1, 1]} : vector<16x128xbf16> to vector<16x32xbf16>
    %cst_22 = arith.constant dense<0.000000e+00> : vector<8x16xf32>
    %74 = tpu.matmul %71, %72, %cst_22 {dimension_numbers = #tpu.dot_dimension_numbers<[1], [1], [0], [0], [0, 0, 1, 0], [], []>} : vector<8x32xbf16>, vector<16x32xbf16>, vector<8x16xf32> -> vector<8x16xf32>
    %cst_23 = arith.constant 0.176776692 : f32
    %75 = vector.broadcast %cst_23 : f32 to vector<8x16xf32>
    %76 = arith.mulf %74, %75 : vector<8x16xf32>
    %77 = vector.broadcast %7 : vector<1x16xf32> to vector<8x16xf32>
    %78 = arith.addf %76, %77 : vector<8x16xf32>
    %cst_24 = arith.constant dense<0xFF800000> : vector<8xf32>
    %79 = vector.multi_reduction <maximumf>, %78, %cst_24 [1] : vector<8x16xf32> to vector<8xf32>
    %80 = vector.shape_cast %79 : vector<8xf32> to vector<8x1xf32>
    %81 = vector.broadcast %80 : vector<8x1xf32> to vector<8x16xf32>
    %82 = arith.subf %78, %81 : vector<8x16xf32>
    %83 = math.exp %82 : vector<8x16xf32>
    %cst_25 = arith.constant dense<0.000000e+00> : vector<8xf32>
    %84 = vector.multi_reduction <add>, %83, %cst_25 [1] : vector<8x16xf32> to vector<8xf32>
    %85 = vector.shape_cast %84 : vector<8xf32> to vector<8x1xf32>
    %86 = tpu.reciprocal %85 {approx = true} : vector<8x1xf32> -> vector<8x1xf32>
    %87 = vector.broadcast %86 : vector<8x1xf32> to vector<8x16xf32>
    %88 = arith.mulf %83, %87 : vector<8x16xf32>
    %89 = arith.truncf %88 : vector<8x16xf32> to vector<8x16xbf16>
    %cst_26 = arith.constant dense<0.000000e+00> : vector<8x32xf32>
    %90 = tpu.matmul %89, %73, %cst_26 {dimension_numbers = #tpu.dot_dimension_numbers<[1], [0], [0], [1], [0, 0, 1, 1], [], []>} : vector<8x16xbf16>, vector<16x32xbf16>, vector<8x32xf32> -> vector<8x32xf32>
    %91 = arith.truncf %90 : vector<8x32xf32> to vector<8x32xbf16>
    %92 = tpu.concatenate %28, %49, %70, %91 in 1 : vector<8x32xbf16>, vector<8x32xbf16>, vector<8x32xbf16>, vector<8x32xbf16> -> vector<8x128xbf16>
    %c0_27 = arith.constant 0 : index
    %c0_28 = arith.constant 0 : index
    %93 = vector.load %arg6[%c0_27, %c0_28] : memref<128x128xbf16, #tpu.memory_space<vmem>>, vector<128x128xbf16>
    %cst_29 = arith.constant dense<0.000000e+00> : vector<8x128xf32>
    %94 = tpu.matmul %92, %93, %cst_29 {dimension_numbers = #tpu.dot_dimension_numbers<[1], [0], [0], [1], [0, 0, 1, 1], [], []>} : vector<8x128xbf16>, vector<128x128xbf16>, vector<8x128xf32> -> vector<8x128xf32>
    %c0_30 = arith.constant 0 : index
    %c0_31 = arith.constant 0 : index
    %95 = vector.load %arg7[%c0_30, %c0_31] : memref<1x128xf32, #tpu.memory_space<vmem>>, vector<1x128xf32>
    %96 = vector.broadcast %95 : vector<1x128xf32> to vector<8x128xf32>
    %97 = arith.addf %94, %96 : vector<8x128xf32>
    %c0_32 = arith.constant 0 : index
    %c0_33 = arith.constant 0 : index
    %c0_34 = arith.constant 0 : index
    %98 = vector.load %arg5[%c0_32, %c0_33, %c0_34] : memref<1x8x128xf32, #tpu.memory_space<vmem>>, vector<1x8x128xf32>
    %99 = vector.shape_cast %98 : vector<1x8x128xf32> to vector<8x128xf32>
    %100 = arith.addf %99, %97 : vector<8x128xf32>
    %cst_35 = arith.constant dense<0.000000e+00> : vector<8xf32>
    %101 = vector.multi_reduction <add>, %100, %cst_35 [1] : vector<8x128xf32> to vector<8xf32>
    %102 = vector.shape_cast %101 : vector<8xf32> to vector<8x1xf32>
    %cst_36 = arith.constant 1.280000e+02 : f32
    %103 = vector.broadcast %cst_36 : f32 to vector<8x1xf32>
    %104 = arith.divf %102, %103 : vector<8x1xf32>
    %105 = vector.broadcast %104 : vector<8x1xf32> to vector<8x128xf32>
    %106 = arith.subf %100, %105 : vector<8x128xf32>
    %107 = arith.mulf %106, %106 : vector<8x128xf32>
    %cst_37 = arith.constant dense<0.000000e+00> : vector<8xf32>
    %108 = vector.multi_reduction <add>, %107, %cst_37 [1] : vector<8x128xf32> to vector<8xf32>
    %109 = vector.shape_cast %108 : vector<8xf32> to vector<8x1xf32>
    %cst_38 = arith.constant 1.280000e+02 : f32
    %110 = vector.broadcast %cst_38 : f32 to vector<8x1xf32>
    %111 = arith.divf %109, %110 : vector<8x1xf32>
    %112 = vector.broadcast %104 : vector<8x1xf32> to vector<8x128xf32>
    %113 = arith.subf %100, %112 : vector<8x128xf32>
    %cst_39 = arith.constant 9.99999974E-6 : f32
    %114 = vector.broadcast %cst_39 : f32 to vector<8x1xf32>
    %115 = arith.addf %111, %114 : vector<8x1xf32>
    %116 = math.rsqrt %115 : vector<8x1xf32>
    %117 = vector.broadcast %116 : vector<8x1xf32> to vector<8x128xf32>
    %118 = arith.mulf %113, %117 : vector<8x128xf32>
    %c0_40 = arith.constant 0 : index
    %c0_41 = arith.constant 0 : index
    %119 = vector.load %arg8[%c0_40, %c0_41] : memref<1x128xf32, #tpu.memory_space<vmem>>, vector<1x128xf32>
    %120 = vector.broadcast %119 : vector<1x128xf32> to vector<8x128xf32>
    %121 = arith.mulf %118, %120 : vector<8x128xf32>
    %c0_42 = arith.constant 0 : index
    %c0_43 = arith.constant 0 : index
    %122 = vector.load %arg9[%c0_42, %c0_43] : memref<1x128xf32, #tpu.memory_space<vmem>>, vector<1x128xf32>
    %123 = vector.broadcast %122 : vector<1x128xf32> to vector<8x128xf32>
    %124 = arith.addf %121, %123 : vector<8x128xf32>
    %c0_44 = arith.constant 0 : index
    %c0_45 = arith.constant 0 : index
    %c0_46 = arith.constant 0 : index
    %125 = vector.load %arg10[%c0_44, %c0_45, %c0_46] : memref<1x8x128xf32, #tpu.memory_space<vmem>>, vector<1x8x128xf32>
    %126 = vector.shape_cast %125 : vector<1x8x128xf32> to vector<8x128xf32>
    %127 = vector.shape_cast %124 : vector<8x128xf32> to vector<1x8x128xf32>
    tpu.vector_store %arg10[%c0_44, %c0_45, %c0_46], %127 {strides = array<i32>} : memref<1x8x128xf32, #tpu.memory_space<vmem>>, vector<1x8x128xf32>,
    return
  }
  func.func @transform_0(%arg0: i32, %arg1: i32) -> (i32, i32, i32) {
    %c0_i32 = arith.constant 0 : i32
    %c0_i32_0 = arith.constant 0 : i32
    return %arg0, %arg1, %c0_i32 : i32, i32, i32
  }
  func.func @transform_1(%arg0: i32, %arg1: i32) -> (i32, i32, i32) {
    %c0_i32 = arith.constant 0 : i32
    %c0_i32_0 = arith.constant 0 : i32
    %c0_i32_1 = arith.constant 0 : i32
    return %arg0, %c0_i32, %c0_i32_0 : i32, i32, i32
  }
  func.func @transform_2(%arg0: i32, %arg1: i32) -> (i32, i32, i32) {
    %c0_i32 = arith.constant 0 : i32
    %c0_i32_0 = arith.constant 0 : i32
    %c0_i32_1 = arith.constant 0 : i32
    return %arg0, %c0_i32, %c0_i32_0 : i32, i32, i32
  }
  func.func @transform_3(%arg0: i32, %arg1: i32) -> (i32, i32, i32) {
    %c0_i32 = arith.constant 0 : i32
    %c0_i32_0 = arith.constant 0 : i32
    return %arg0, %arg1, %c0_i32 : i32, i32, i32
  }
  func.func @transform_4(%arg0: i32, %arg1: i32) -> (i32, i32) {
    %c0_i32 = arith.constant 0 : i32
    %c0_i32_0 = arith.constant 0 : i32
    %c0_i32_1 = arith.constant 0 : i32
    return %c0_i32, %c0_i32_0 : i32, i32
  }
  func.func @transform_5(%arg0: i32, %arg1: i32) -> (i32, i32) {
    %c0_i32 = arith.constant 0 : i32
    %c0_i32_0 = arith.constant 0 : i32
    %c0_i32_1 = arith.constant 0 : i32
    return %c0_i32, %c0_i32_0 : i32, i32
  }
  func.func @transform_6(%arg0: i32, %arg1: i32) -> (i32, i32) {
    %c0_i32 = arith.constant 0 : i32
    %c0_i32_0 = arith.constant 0 : i32
    %c0_i32_1 = arith.constant 0 : i32
    return %c0_i32, %c0_i32_0 : i32, i32
  }
  func.func @transform_7(%arg0: i32, %arg1: i32) -> (i32, i32) {
    %c0_i32 = arith.constant 0 : i32
    %c0_i32_0 = arith.constant 0 : i32
    %c0_i32_1 = arith.constant 0 : i32
    return %c0_i32, %c0_i32_0 : i32, i32
  }
  func.func @transform_8(%arg0: i32, %arg1: i32) -> (i32, i32, i32) {
    %c0_i32 = arith.constant 0 : i32
    %c0_i32_0 = arith.constant 0 : i32
    return %arg0, %arg1, %c0_i32 : i32, i32, i32
  }
}

module attributes {stable_mosaic.version = 11 : i64} {
  func.func @_ffn_kernel(%arg0: i32, %arg1: memref<16x128xf32, #tpu.memory_space<vmem>>, %arg2: memref<128x256xbf16, #tpu.memory_space<vmem>>, %arg3: memref<1x256xf32, #tpu.memory_space<vmem>>, %arg4: memref<256x128xbf16, #tpu.memory_space<vmem>>, %arg5: memref<1x128xf32, #tpu.memory_space<vmem>>, %arg6: memref<1x128xf32, #tpu.memory_space<vmem>>, %arg7: memref<1x128xf32, #tpu.memory_space<vmem>>, %arg8: memref<16x128xf32, #tpu.memory_space<vmem>>) attributes {dimension_semantics = [#tpu.dimension_semantics<parallel>], iteration_bounds = array<i64: 1>, scalar_prefetch = 0 : i64, scratch_operands = 0 : i64, tpu.core_type = #tpu.core_type<tc>, window_params = [{transform_indices = @transform_0, window_bounds = array<i64: 16, 128>}, {pipeline_mode = #tpu.pipeline_mode<synchronous>, transform_indices = @transform_1, window_bounds = array<i64: 128, 256>}, {pipeline_mode = #tpu.pipeline_mode<synchronous>, transform_indices = @transform_2, window_bounds = array<i64: 1, 256>}, {pipeline_mode = #tpu.pipeline_mode<synchronous>, transform_indices = @transform_3, window_bounds = array<i64: 256, 128>}, {pipeline_mode = #tpu.pipeline_mode<synchronous>, transform_indices = @transform_4, window_bounds = array<i64: 1, 128>}, {pipeline_mode = #tpu.pipeline_mode<synchronous>, transform_indices = @transform_5, window_bounds = array<i64: 1, 128>}, {pipeline_mode = #tpu.pipeline_mode<synchronous>, transform_indices = @transform_6, window_bounds = array<i64: 1, 128>}, {transform_indices = @transform_7, window_bounds = array<i64: 16, 128>}]} {
    %c0 = arith.constant 0 : index
    %c0_0 = arith.constant 0 : index
    %0 = vector.load %arg1[%c0, %c0_0] : memref<16x128xf32, #tpu.memory_space<vmem>>, vector<16x128xf32>
    %1 = arith.truncf %0 : vector<16x128xf32> to vector<16x128xbf16>
    %c0_1 = arith.constant 0 : index
    %c0_2 = arith.constant 0 : index
    %2 = vector.load %arg2[%c0_1, %c0_2] : memref<128x256xbf16, #tpu.memory_space<vmem>>, vector<128x256xbf16>
    %cst = arith.constant dense<0.000000e+00> : vector<16x256xf32>
    %3 = tpu.matmul %1, %2, %cst {dimension_numbers = #tpu.dot_dimension_numbers<[1], [0], [0], [1], [0, 0, 1, 1], [], []>} : vector<16x128xbf16>, vector<128x256xbf16>, vector<16x256xf32> -> vector<16x256xf32>
    %c0_3 = arith.constant 0 : index
    %c0_4 = arith.constant 0 : index
    %4 = vector.load %arg3[%c0_3, %c0_4] : memref<1x256xf32, #tpu.memory_space<vmem>>, vector<1x256xf32>
    %5 = vector.broadcast %4 : vector<1x256xf32> to vector<16x256xf32>
    %6 = arith.addf %3, %5 : vector<16x256xf32>
    %cst_5 = arith.constant 0.000000e+00 : f32
    %7 = vector.broadcast %cst_5 : f32 to vector<16x256xf32>
    %8 = arith.maximumf %6, %7 : vector<16x256xf32>
    %9 = arith.truncf %8 : vector<16x256xf32> to vector<16x256xbf16>
    %c0_6 = arith.constant 0 : index
    %c0_7 = arith.constant 0 : index
    %10 = vector.load %arg4[%c0_6, %c0_7] : memref<256x128xbf16, #tpu.memory_space<vmem>>, vector<256x128xbf16>
    %cst_8 = arith.constant dense<0.000000e+00> : vector<16x128xf32>
    %11 = tpu.matmul %9, %10, %cst_8 {dimension_numbers = #tpu.dot_dimension_numbers<[1], [0], [0], [1], [0, 0, 1, 1], [], []>} : vector<16x256xbf16>, vector<256x128xbf16>, vector<16x128xf32> -> vector<16x128xf32>
    %c0_9 = arith.constant 0 : index
    %c0_10 = arith.constant 0 : index
    %12 = vector.load %arg5[%c0_9, %c0_10] : memref<1x128xf32, #tpu.memory_space<vmem>>, vector<1x128xf32>
    %13 = vector.broadcast %12 : vector<1x128xf32> to vector<16x128xf32>
    %14 = arith.addf %11, %13 : vector<16x128xf32>
    %15 = arith.addf %0, %14 : vector<16x128xf32>
    %cst_11 = arith.constant dense<0.000000e+00> : vector<16xf32>
    %16 = vector.multi_reduction <add>, %15, %cst_11 [1] : vector<16x128xf32> to vector<16xf32>
    %17 = vector.shape_cast %16 : vector<16xf32> to vector<16x1xf32>
    %cst_12 = arith.constant 1.280000e+02 : f32
    %18 = vector.broadcast %cst_12 : f32 to vector<16x1xf32>
    %19 = arith.divf %17, %18 : vector<16x1xf32>
    %20 = vector.broadcast %19 : vector<16x1xf32> to vector<16x128xf32>
    %21 = arith.subf %15, %20 : vector<16x128xf32>
    %22 = arith.mulf %21, %21 : vector<16x128xf32>
    %cst_13 = arith.constant dense<0.000000e+00> : vector<16xf32>
    %23 = vector.multi_reduction <add>, %22, %cst_13 [1] : vector<16x128xf32> to vector<16xf32>
    %24 = vector.shape_cast %23 : vector<16xf32> to vector<16x1xf32>
    %cst_14 = arith.constant 1.280000e+02 : f32
    %25 = vector.broadcast %cst_14 : f32 to vector<16x1xf32>
    %26 = arith.divf %24, %25 : vector<16x1xf32>
    %27 = vector.broadcast %19 : vector<16x1xf32> to vector<16x128xf32>
    %28 = arith.subf %15, %27 : vector<16x128xf32>
    %cst_15 = arith.constant 9.99999974E-6 : f32
    %29 = vector.broadcast %cst_15 : f32 to vector<16x1xf32>
    %30 = arith.addf %26, %29 : vector<16x1xf32>
    %31 = math.rsqrt %30 : vector<16x1xf32>
    %32 = vector.broadcast %31 : vector<16x1xf32> to vector<16x128xf32>
    %33 = arith.mulf %28, %32 : vector<16x128xf32>
    %c0_16 = arith.constant 0 : index
    %c0_17 = arith.constant 0 : index
    %34 = vector.load %arg6[%c0_16, %c0_17] : memref<1x128xf32, #tpu.memory_space<vmem>>, vector<1x128xf32>
    %35 = vector.broadcast %34 : vector<1x128xf32> to vector<16x128xf32>
    %36 = arith.mulf %33, %35 : vector<16x128xf32>
    %c0_18 = arith.constant 0 : index
    %c0_19 = arith.constant 0 : index
    %37 = vector.load %arg7[%c0_18, %c0_19] : memref<1x128xf32, #tpu.memory_space<vmem>>, vector<1x128xf32>
    %38 = vector.broadcast %37 : vector<1x128xf32> to vector<16x128xf32>
    %39 = arith.addf %36, %38 : vector<16x128xf32>
    %c0_20 = arith.constant 0 : index
    %c0_21 = arith.constant 0 : index
    %40 = vector.load %arg8[%c0_20, %c0_21] : memref<16x128xf32, #tpu.memory_space<vmem>>, vector<16x128xf32>
    tpu.vector_store %arg8[%c0_20, %c0_21], %39 {strides = array<i32>} : memref<16x128xf32, #tpu.memory_space<vmem>>, vector<16x128xf32>,
    return
  }
  func.func @transform_0(%arg0: i32) -> (i32, i32) {
    %c0_i32 = arith.constant 0 : i32
    %c0_i32_0 = arith.constant 0 : i32
    return %arg0, %c0_i32 : i32, i32
  }
  func.func @transform_1(%arg0: i32) -> (i32, i32) {
    %c0_i32 = arith.constant 0 : i32
    %c0_i32_0 = arith.constant 0 : i32
    %c0_i32_1 = arith.constant 0 : i32
    return %c0_i32, %c0_i32_0 : i32, i32
  }
  func.func @transform_2(%arg0: i32) -> (i32, i32) {
    %c0_i32 = arith.constant 0 : i32
    %c0_i32_0 = arith.constant 0 : i32
    %c0_i32_1 = arith.constant 0 : i32
    return %c0_i32, %c0_i32_0 : i32, i32
  }
  func.func @transform_3(%arg0: i32) -> (i32, i32) {
    %c0_i32 = arith.constant 0 : i32
    %c0_i32_0 = arith.constant 0 : i32
    %c0_i32_1 = arith.constant 0 : i32
    return %c0_i32, %c0_i32_0 : i32, i32
  }
  func.func @transform_4(%arg0: i32) -> (i32, i32) {
    %c0_i32 = arith.constant 0 : i32
    %c0_i32_0 = arith.constant 0 : i32
    %c0_i32_1 = arith.constant 0 : i32
    return %c0_i32, %c0_i32_0 : i32, i32
  }
  func.func @transform_5(%arg0: i32) -> (i32, i32) {
    %c0_i32 = arith.constant 0 : i32
    %c0_i32_0 = arith.constant 0 : i32
    %c0_i32_1 = arith.constant 0 : i32
    return %c0_i32, %c0_i32_0 : i32, i32
  }
  func.func @transform_6(%arg0: i32) -> (i32, i32) {
    %c0_i32 = arith.constant 0 : i32
    %c0_i32_0 = arith.constant 0 : i32
    %c0_i32_1 = arith.constant 0 : i32
    return %c0_i32, %c0_i32_0 : i32, i32
  }
  func.func @transform_7(%arg0: i32) -> (i32, i32) {
    %c0_i32 = arith.constant 0 : i32
    %c0_i32_0 = arith.constant 0 : i32
    return %arg0, %c0_i32 : i32, i32
  }
}

</mosaic_0001>

<bundles_post_ra>
// kernel: span_attention_layer.8
= control target key start
LH: loop header
LB: loop body
LE: loop exit
PB: predicated region body
PF: predicated region fallthrough
CT: control target
= control target key end

     0   :  { %v208_v0 = vmov 0.0   ;;  %vm209_vm0 = vmmov 0   ;;  %s277_s2 = inlined_call_operand.vmem [shape: bf16[128,128], index: 2, kind: input, shape index: {}]   ;;  %s278_s0 = inlined_call_operand.vmem [shape: f32[16,128], index: 0, kind: input, shape index: {}]   ;;  %s279_s1 = inlined_call_operand.vmem [shape: f32[16,128], index: 1, kind: input, shape index: {}]   ;;  %s280_s3 = inlined_call_operand.vmem [shape: f32[1,128], index: 3, kind: input, shape index: {}]   ;;  %s281_s4 = inlined_call_operand.vmem [shape: bf16[16,128], index: 4, kind: output, shape index: {}]  }
   0x1   :  { %178 = vmatprep.subr.bf16.mxu0 %v208_v0  ;;  %v200_v1 = vld [vmem:[%s277_s2] sm:$0xff]   ;;  %194 = vmatprep.mubr.msk.bf16.mxu0 %vm209_vm0, %v208_v0  ;;  %v201_v2 = vld [vmem:[%s277_s2 + $0x8] sm:$0xff]   ;;  %v202_v3 = vld [vmem:[%s277_s2 + $0x10] sm:$0xff]  }
   0x2   :  { %179 = vmatpush3.bf16.msra.mxu0 %v200_v1  ;;  %v203_v4 = vld [vmem:[%s277_s2 + $0x18] sm:$0xff]   ;;  %v204_v5 = vld [vmem:[%s277_s2 + $0x20] sm:$0xff]   ;;  %v205_v6 = vld [vmem:[%s277_s2 + $0x28] sm:$0xff]  }
   0x3   :  { %180 = vmatprep.subr.bf16.mxu0 %v208_v0  ;;  %v206_v7 = vld [vmem:[%s277_s2 + $0x30] sm:$0xff]   ;;  %v18_v8 = vld [vmem:[%s278_s0] sm:$0xff]  ;;  %v19_v9 = vld [vmem:[%s278_s0 + $0x8] sm:$0xff] }
   0x4   :  { %v20_v10 = vld [vmem:[%s279_s1] sm:$0xff]  ;;  %v21_v11 = vld [vmem:[%s279_s1 + $0x8] sm:$0xff]  ;;  %v207_v14 = vld [vmem:[%s277_s2 + $0x38] sm:$0xff]  }
   0x5   :  { %v22_v12 = vadd.f32 %v20_v10, %v18_v8  ;;  %v23_v13 = vadd.f32 %v21_v11, %v19_v9  ;;  %v151_v16 = vld [vmem:[%s280_s3] ss:$0 sm:$0xff] }
   0x6   :  { %181 = vmatpush3.bf16.msra.mxu0 %v201_v2 }
   0x7   :  { %182 = vmatprep.subr.bf16.mxu0 %v208_v0  ;;  %v24_v15 = vpack.c.bf16 %v23_v13, %v22_v12 }
   0xa   :  { %183 = vmatpush3.bf16.msra.mxu0 %v202_v3 }
   0xb   :  { %184 = vmatprep.subr.bf16.mxu0 %v208_v0 }
   0xe   :  { %185 = vmatpush3.bf16.msra.mxu0 %v203_v4 }
   0xf   :  { %186 = vmatprep.subr.bf16.mxu0 %v208_v0 }
  0x12   :  { %187 = vmatpush3.bf16.msra.mxu0 %v204_v5 }
  0x13   :  { %188 = vmatprep.subr.bf16.mxu0 %v208_v0 }
  0x16   :  { %189 = vmatpush3.bf16.msra.mxu0 %v205_v6 }
  0x17   :  { %190 = vmatprep.subr.bf16.mxu0 %v208_v0 }
  0x1a   :  { %191 = vmatpush3.bf16.msra.mxu0 %v206_v7 }
  0x1b   :  { %192 = vmatprep.subr.bf16.mxu0 %v208_v0 }
  0x1e   :  { %193 = vmatpush3.bf16.msra.mxu0 %v207_v14 }
  0x21   :  { %195 = vmatmul.mubr.bf16.vlgmr.msra.gmra.mrb[0].mxu0 %v24_v15 }
  0xf4   :  { %v130_v17 = vpop.f32.mrb[0].mxu0 }
  0xf5   :  { %v196_v18 = vpop.f32.mrb[1].mxu0  ;;  %v131_v20 = vadd.f32 %v151_v16, %v130_v17 }
  0xf6   :  { %v133_v19 = vpop.f32.mrb[2].mxu0 }
  0xf7   :  { %v134_v21 = vadd.f32 %v151_v16, %v133_v19  ;;  %v197_v22 = vpop.f32.mrb[3].mxu0 }
  0xf9   :  { %v167_v23 = vpack.c.bf16 %v134_v21, %v131_v20 }
  0xfb   :  { %168 = vst [vmem:[%s281_s4] sm:$0xff] %v167_v23  }

// kernel: span_attention_layer.6
= control target key start
LH: loop header
LB: loop body
LE: loop exit
PB: predicated region body
PF: predicated region fallthrough
CT: control target
= control target key end

     0   :  { %13 = vsyncpa [#allocation3], 0  ;;  %s657_s0 = inlined_call_operand.vmem [shape: f32[16,128], index: 0, kind: input, shape index: {}]   ;;  %s658_s1 = inlined_call_operand.hbm [shape: f32[16,128], index: 1, kind: input, shape index: {}]   ;;  %s659_s2 = inlined_call_operand.vmem [shape: bf16[128,256], index: 2, kind: input, shape index: {}]   ;;  %s660_s3 = inlined_call_operand.vmem [shape: f32[1,256], index: 3, kind: input, shape index: {}]   ;;  %s661_s4 = inlined_call_operand.hbm [shape: bf16[128,128], index: 4, kind: input, shape index: {}]   ;;  %s662_s5 = inlined_call_operand.vmem [shape: f32[1,128], index: 5, kind: input, shape index: {}]   ;;  %s663_s6 = inlined_call_operand.vmem [shape: bf16[16,128], index: 6, kind: output, shape index: {0}]   ;;  %s664_s7 = inlined_call_operand.vmem [shape: bf16[16,256], index: 7, kind: output, shape index: {1}]  }
   0x1   :  { %14 = vsyncpa [#allocation5], 0  ;;  %s515_s24 = smov [#allocation2]   ;;  %s467_s28 = scalar_lea.hbm %s658_s1, 256 }
   0x2   :  { %s22_s25 = sshll.u32 %s515_s24, 4  ;;  %p468_p0 = scmp.ne.s32.totalorder %s658_s1, %s467_s28  ;;  %s23_s25 = int_to_ptr.vmem [resolvable:$true] %s22_s25 }
   0x3   :  { %p471_p1 = scmp.lt.u32.totalorder %s467_s28, %s658_s1 }
   0x5   :  { %p473_p2 = pnand %p471_p1, %p468_p0 }
   0x7   :  { %476 = shalt.err (!%p473_p2)
}
   0x8   :  { %s477_s10 = scalar_lea.vmem %s23_s25, 256  ;;  %p482_p4 = scmp.lt.s32.totalorder %s23_s25, %s23_s25 }
   0x9   :  { %p478_p3 = scmp.ne.s32.totalorder %s23_s25, %s477_s10  ;;  %p483_p5 = scmp.lt.s32.totalorder %s477_s10, %s477_s10 }
   0xb   :  { %p484_p6 = por %p483_p5, %p482_p4 }
   0xd   :  { %p485_p7 = pnand %p484_p6, %p478_p3 }
   0xf   :  { %488 = shalt.err (!%p485_p7)
}
  0x10   :  { %s516_s11 = smov 128   ;;  %s517_s12 = smov 8  }
  0x11   :  { %28 = dma.hbm_to_vmem [thread:$0]  %s658_s1, 256, %s23_s25, [#allocation3], %s516_s11, %s516_s11, %s517_s12  }
  0x12   :  { %s518_s15 = smov [#allocation4]   ;;  %s489_s19 = scalar_lea.hbm %s661_s4, 1024 }
  0x13   :  { %s38_s16 = sshll.u32 %s518_s15, 4  ;;  %p490_p8 = scmp.ne.s32.totalorder %s661_s4, %s489_s19  ;;  %s39_s16 = int_to_ptr.vmem [resolvable:$true] %s38_s16 }
  0x14   :  { %p493_p9 = scmp.lt.u32.totalorder %s489_s19, %s661_s4 }
  0x16   :  { %p495_p10 = pnand %p493_p9, %p490_p8 }
  0x18   :  { %498 = shalt.err (!%p495_p10)
}
  0x19   :  { %s499_s24 = scalar_lea.vmem %s39_s16, 1024  ;;  %p504_p12 = scmp.lt.s32.totalorder %s39_s16, %s39_s16 }
  0x1a   :  { %p500_p11 = scmp.ne.s32.totalorder %s39_s16, %s499_s24  ;;  %p505_p13 = scmp.lt.s32.totalorder %s499_s24, %s499_s24 }
  0x1c   :  { %p506_p0 = por %p505_p13, %p504_p12 }
  0x1e   :  { %p507_p1 = pnand %p506_p0, %p500_p11 }
  0x20   :  { %510 = shalt.err (!%p507_p1)
}
  0x21   :  { %s519_s1 = smov 64   ;;  %s520_s25 = smov 4  }
  0x22   :  { %44 = dma.hbm_to_vmem [thread:$0]  %s661_s4, 1024, %s39_s16, [#allocation5], %s519_s1, %s519_s1, %s520_s25  }
  0x23   :  { %511 = dma.done.wait [#allocation3], 256  }
  0x24   :  { %512 = vsyncadd [#allocation3], 4294967040 }
  0x25   :  { %513 = dma.done.wait [#allocation5], 1024  }
  0x26   :  { %514 = vsyncadd [#allocation5], 4294966272  ;;  %v521_v0 = vmov 0.0   ;;  %vm522_vm0 = vmmov 0   ;;  %v523_v1 = vmov 0   ;;  %v437_v3 = vld [vmem:[#allocation4] sm:$0xff]   ;;  %v79_v34 = vlaneseq }
  0x27   :  { %406 = vmatprep.subr.bf16.mxu1 %v521_v0  ;;  %422 = vmatprep.mubr.msk.bf16.mxu1 %vm522_vm0, %v521_v0  ;;  %v435_v2 = vld [vmem:[%s659_s2 + $0x4] ss:$8 sps:$4 sm:$0xff]   ;;  %v438_v4 = vld [vmem:[%s659_s2] ss:$8 sps:$4 sm:$0xff]   ;;  %v439_v5 = vld [vmem:[%s659_s2 + $0x14] ss:$8 sps:$4 sm:$0xff]  }
  0x28   :  { %201 = vmatprep.mubr.bf16.mxu0 %v523_v1  ;;  %169 = vmatprep.subr.bf16.mxu0 %v435_v2  ;;  %v441_v6 = vld [vmem:[#allocation4 + $0x8] sm:$0xff]   ;;  %v443_v8 = vld [vmem:[%s659_s2 + $0x24] ss:$8 sps:$4 sm:$0xff]   ;;  %v446_v10 = vld [vmem:[%s659_s2 + $0x20] ss:$8 sps:$4 sm:$0xff]   ;;  %v80_v35 = vshrl.u32 %v79_v34, 7 }
  0x29   :  { %407 = vmatpush3.bf16.msra.mxu1 %v437_v3  ;;  %170 = vmatpush1.bf16.msra.mxu0 %v438_v4  ;;  %v442_v7 = vld [vmem:[%s659_s2 + $0x10] ss:$8 sps:$4 sm:$0xff]   ;;  %v445_v9 = vld [vmem:[#allocation4 + $0x10] sm:$0xff]   ;;  %v447_v11 = vld [vmem:[%s659_s2 + $0x34] ss:$8 sps:$4 sm:$0xff]  }
  0x2a   :  { %408 = vmatprep.subr.bf16.mxu1 %v521_v0  ;;  %171 = vmatprep.subr.bf16.mxu0 %v439_v5  ;;  %v449_v12 = vld [vmem:[#allocation4 + $0x18] sm:$0xff]   ;;  %v450_v13 = vld [vmem:[%s659_s2 + $0x30] ss:$8 sps:$4 sm:$0xff]   ;;  %v455_v17 = vld [vmem:[%s659_s2 + $0x54] ss:$8 sps:$4 sm:$0xff]   ;;  %v85_v36 = vsub.s32 1, %v80_v35 }
  0x2b   :  { %v451_v14 = vld [vmem:[%s659_s2 + $0x44] ss:$8 sps:$4 sm:$0xff]   ;;  %v453_v15 = vld [vmem:[#allocation4 + $0x20] sm:$0xff]   ;;  %v454_v16 = vld [vmem:[%s659_s2 + $0x40] ss:$8 sps:$4 sm:$0xff]   ;;  %v81_v38 = vsub.s32 0, %v80_v35 }
  0x2c   :  { %v457_v18 = vld [vmem:[#allocation4 + $0x28] sm:$0xff]   ;;  %v459_v20 = vld [vmem:[%s659_s2 + $0x64] ss:$8 sps:$4 sm:$0xff]   ;;  %v462_v22 = vld [vmem:[%s659_s2 + $0x60] ss:$8 sps:$4 sm:$0xff]  }
  0x2d   :  { %409 = vmatpush3.bf16.msra.mxu1 %v441_v6  ;;  %172 = vmatpush1.bf16.msra.mxu0 %v442_v7  ;;  %v458_v19 = vld [vmem:[%s659_s2 + $0x50] ss:$8 sps:$4 sm:$0xff]   ;;  %v461_v21 = vld [vmem:[#allocation4 + $0x30] sm:$0xff]   ;;  %v55_v24 = vld [vmem:[%s657_s0 + $0x8] sm:$0xff] }
  0x2e   :  { %410 = vmatprep.subr.bf16.mxu1 %v521_v0  ;;  %173 = vmatprep.subr.bf16.mxu0 %v443_v8  ;;  %v54_v23 = vld [vmem:[%s657_s0] sm:$0xff]  ;;  %v57_v26 = vld [vmem:[#allocation2 + $0x8] sm:$0xff]  ;;  %v463_v27 = vld [vmem:[%s659_s2 + $0x74] ss:$8 sps:$4 sm:$0xff]  }
  0x2f   :  { %v56_v25 = vld [vmem:[#allocation2] sm:$0xff]  ;;  %v465_v28 = vld [vmem:[#allocation4 + $0x38] sm:$0xff]   ;;  %v59_v30 = vadd.f32 %v57_v26, %v55_v24  ;;  %v466_v31 = vld [vmem:[%s659_s2 + $0x70] ss:$8 sps:$4 sm:$0xff]   ;;  %v212_v32 = vpack.c.bf16 %v55_v24, %v54_v23 }
  0x30   :  { %v58_v29 = vadd.f32 %v56_v25, %v54_v23  ;;  %v77_v37 = vld [vmem:[%s660_s3] sm:$0x3] }
  0x31   :  { %411 = vmatpush3.bf16.msra.mxu1 %v445_v9  ;;  %174 = vmatpush1.bf16.msra.mxu0 %v446_v10  ;;  %v375_v39 = vld [vmem:[%s662_s5] ss:$0 sm:$0xff]  ;;  %v86_v40 = vrot.slane %v77_v37, %v85_v36  ;;  %v82_v42 = vrot.slane %v77_v37, %v81_v38 }
  0x32   :  { %412 = vmatprep.subr.bf16.mxu1 %v521_v0  ;;  %175 = vmatprep.subr.bf16.mxu0 %v447_v11  ;;  %v60_v33 = vpack.c.bf16 %v59_v30, %v58_v29 }
  0x35   :  { %413 = vmatpush3.bf16.msra.mxu1 %v449_v12  ;;  %176 = vmatpush1.bf16.msra.mxu0 %v450_v13 }
  0x36   :  { %414 = vmatprep.subr.bf16.mxu1 %v521_v0  ;;  %177 = vmatprep.subr.bf16.mxu0 %v451_v14 }
  0x39   :  { %415 = vmatpush3.bf16.msra.mxu1 %v453_v15  ;;  %178 = vmatpush1.bf16.msra.mxu0 %v454_v16 }
  0x3a   :  { %416 = vmatprep.subr.bf16.mxu1 %v521_v0  ;;  %179 = vmatprep.subr.bf16.mxu0 %v455_v17 }
  0x3d   :  { %417 = vmatpush3.bf16.msra.mxu1 %v457_v18  ;;  %180 = vmatpush1.bf16.msra.mxu0 %v458_v19 }
  0x3e   :  { %418 = vmatprep.subr.bf16.mxu1 %v521_v0  ;;  %181 = vmatprep.subr.bf16.mxu0 %v459_v20 }
  0x41   :  { %419 = vmatpush3.bf16.msra.mxu1 %v461_v21  ;;  %182 = vmatpush1.bf16.msra.mxu0 %v462_v22 }
  0x42   :  { %420 = vmatprep.subr.bf16.mxu1 %v521_v0  ;;  %183 = vmatprep.subr.bf16.mxu0 %v463_v27 }
  0x45   :  { %421 = vmatpush3.bf16.msra.mxu1 %v465_v28  ;;  %184 = vmatpush1.bf16.msra.mxu0 %v466_v31 }
  0x48   :  { %423 = vmatmul.mubr.bf16.vlgmr.msra.gmra.mrb[0].mxu1 %v212_v32  ;;  %202 = vmatmul.mubr.bf16.vlgmr.msra.gmra.mrb[0].mxu0 %v60_v33 }
 0x11b   :  { %v318_v41 = vpop.f32.mrb[0].mxu1  ;;  %v203_v44 = vpop.f32.mrb[0].mxu0 }
 0x11c   :  { %v319_v43 = vadd.f32 %v375_v39, %v318_v41  ;;  %v424_v45 = vpop.f32.mrb[1].mxu1  ;;  %v205_v46 = vpop.f32.mrb[1].mxu0  ;;  %v204_v51 = vadd.f32 %v203_v44, %v82_v42 }
 0x11d   :  { %v321_v47 = vpop.f32.mrb[2].mxu1  ;;  %v206_v48 = vadd.f32 %v205_v46, %v86_v40  ;;  %v207_v49 = vpop.f32.mrb[2].mxu0 }
 0x11e   :  { %v425_v50 = vpop.f32.mrb[3].mxu1  ;;  %v208_v52 = vadd.f32 %v207_v49, %v82_v42  ;;  %v209_v53 = vpop.f32.mrb[3].mxu0  ;;  %v322_v55 = vadd.f32 %v375_v39, %v321_v47 }
 0x11f   :  { %v390_v54 = vpack.c.bf16 %v319_v43, %v206_v48  ;;  %v210_v56 = vadd.f32 %v209_v53, %v86_v40 }
 0x120   :  { %v395_v57 = vpack.c.bf16 %v208_v52, %v204_v51 }
 0x121   :  { %347 = vst [vmem:[%s664_s7] sm:$0xff] %v390_v54  ;;  %v391_v58 = vpack.c.bf16 %v322_v55, %v210_v56 }
 0x122   :  { %396 = vst [vmem:[%s663_s6] sm:$0xff] %v395_v57  }
 0x123   :  { %348 = vst [vmem:[%s664_s7 + $0x8] sm:$0xff] %v391_v58 }
 0x124   :  { %357 = vsyncpa [#allocation3], 1 }
 0x125   :  { %358 = vsyncpa [#allocation5], 1 }

// kernel: span_attention_layer.7
= control target key start
LH: loop header
LB: loop body
LE: loop exit
PB: predicated region body
PF: predicated region fallthrough
CT: control target
= control target key end

     0   :  { %s1326_s24 = smov 0   ;;  %s1328_s25 = smov 0   ;;  %s1484_s0 = inlined_call_operand.vmem [shape: bf16[2,8,128], index: 0, kind: input, shape index: {}]   ;;  %s1485_s1 = inlined_call_operand.vmem [shape: bf16[2,8,256], index: 1, kind: input, shape index: {}]   ;;  %s1486_s2 = inlined_call_operand.vmem [shape: f32[2,8,128], index: 2, kind: input, shape index: {}]   ;;  %s1487_s3 = inlined_call_operand.vmem [shape: bf16[128,128], index: 3, kind: input, shape index: {}]   ;;  %s1488_s4 = inlined_call_operand.vmem [shape: f32[1,128], index: 4, kind: input, shape index: {}]   ;;  %s1489_s5 = inlined_call_operand.vmem [shape: f32[1,128], index: 5, kind: input, shape index: {}]   ;;  %s1490_s6 = inlined_call_operand.vmem [shape: f32[1,128], index: 6, kind: input, shape index: {}]   ;;  %s1491_s7 = inlined_call_operand.vmem [shape: f32[2,8,128], index: 7, kind: output, shape index: {}]  }
   0x1   :  { %s1330_s26 = smov 0  }
   0x2 LB: > { %s29_s27 = sadd.s32 1, %s1275_s25  ;;  %p1075_p0 = scmp.ge.s32.totalorder %s1279_s26, 1  ;;  %s1279_s26 = sphi %s1330_s26, %s17_s26   ;;  %s1275_s25 = sphi %s1328_s25, %s1493_s25   ;;  %s1271_s24 = sphi %s1326_s24, %s1492_s24  }
   0x3   : > { %p31_p1 = scmp.ge.s32.totalorder %s29_s27, 2  ;;  %p279_p2 = scmp.lt.s32.totalorder %s1279_s26, 3 }
   0x5   : > { %s1495_s27 = smov (%p31_p1, %s29_s27), 0  ;;  %p280_p3 = pnand %p1075_p0, %p279_p2 }
   0x6   : > { %p327_p4 = scmp.lt.s32.totalorder (!%p280_p3), %s1271_s24, 1  ;;  %v1281_v0 = vmov (!%p280_p3), 0.0   ;;  %vm1282_vm0 = vmmov (!%p280_p3), 0   ;;  %vm356_vm1 = vcmask (!%p280_p3), 261120   ;;  %vm404_vm2 = vcmask (!%p280_p3), 64512   ;;  %s1283_s13 = smov (!%p280_p3), 96  }
   0x7   : > { %283 = sbr.rel (%p280_p3) target bundleno = 1976 (0x7b8), region = 48  ;;  %1131 = vmatprep.subr.bf16.mxu0 (!%p280_p3), %v1281_v0  ;;  %1133 = vmatprep.mubr.msk.bf16.mxu0 (!%p280_p3), %vm1282_vm0, %v1281_v0  ;;  %s1284_s14 = smov (!%p280_p3), 64   ;;  %vm423_vm3 = vcmask (!%p280_p3), 1043456   ;;  %vm821_vm4 = vcmask (!%p280_p3), 523264   ;;  %vm824_vm5 = vcmask (!%p280_p3), 785408  }
   0x8   : > { %1155 = vmatprep.subr.bf16.mxu1 (!%p280_p3), %v1281_v0  ;;  %1157 = vmatprep.mubr.msk.bf16.mxu1 (!%p280_p3), %vm1282_vm0, %v1281_v0  ;;  %s1285_s15 = smov (!%p280_p3), 32  }
   0xe   : > { %s1497_s24 = smov (!%p327_p4, %s1271_s24), 1 }
   0xf   : > { %s1350_s28 = sshll.u32 %s1497_s24, 3  ;;  %s1076_s9 = sshll.u32 %s1497_s24, 2 }
  0x10   : > { %s338_s8 = scalar_lea.vmem %s1485_s1, %s1350_s28  ;;  %s333_s12 = scalar_lea.vmem %s1484_s0, %s1076_s9 }
  0x11   : > { %v355_v1 = vld [vmem:[%s338_s8] sm:$0xff]  ;;  %s345_s16 = scalar_lea.vmem %s1486_s2, %s1350_s28  ;;  %s352_s24 = scalar_lea.vmem %s1491_s7, %s1350_s28 }
  0x12   : > { %v361_v2 = vsel %vm356_vm1, %v355_v1, 0  ;;  %v354_v3 = vld [vmem:[%s333_s12] sm:$0xf]  ;;  %v1085_v10 = vcombine.low %v355_v1, %v355_v1  ;;  %v1371_v17 = vcombine.high %v355_v1, %v355_v1 }
  0x13   : > { %1132 = vmatpush3.bf16.xpose.msra.mxu0 %v361_v2  ;;  %v1084_v11 = vcombine.low %v354_v3, %v354_v3 }
  0x14   : > { %1137 = vmatprep.subr.bf16.mxu0 %v1281_v0  ;;  %475 = vrot.lane.b32.xlu1 %v1085_v10, %s1283_s13  ;;  %v425_v18 = vsel %vm423_vm3, %v1371_v17, 0 }
  0x18   : > { %471 = vrot.lane.b32.xlu1 %v1084_v11, %s1283_s13 }
  0x1a   : > { %1134 = vmatmul.mubr.msk.bf16.vlgmr.msra.gmra.mrb[0].mxu0 %vm356_vm1, %v354_v3 }
  0x1b   : > { %1139 = vmatprep.mubr.msk.bf16.mxu0 %vm1282_vm0, %v1281_v0  ;;  %1138 = vmatpush3.bf16.msra.mxu0 %v425_v18 }
  0x1c   : > { %585 = vrot.lane.b32.xlu1 %v1084_v11, %s1284_s14  ;;  %1143 = vmatprep.subr.bf16.mxu0 %v1281_v0 }
  0x20   : > { %699 = vrot.lane.b32.xlu1 %v1085_v10, %s1285_s15 }
  0x24   : > { %697 = vrot.lane.b32.xlu1 %v1084_v11, %s1285_s15 }
  0x86   : > { %v476_v19 = vpop.permute.xlu1 %475 }
  0x87   : > { %v481_v30 = vsel %vm356_vm1, %v476_v19, 0 }
  0x8a   : > { %v472_v20 = vpop.permute.xlu1 %471 }
  0x8e   : > { %v586_v22 = vpop.permute.xlu1 %585 }
  0x92   : > { %v700_v25 = vpop.permute.xlu1 %699 }
  0x93   : > { %v705_v27 = vsel %vm356_vm1, %v700_v25, 0  ;;  %v1232_v25 = vld [vmem:[%s1487_s3 + $0x8] sm:$0xff]  }
  0x96   : > { %v698_v31 = vpop.permute.xlu1 %697 }
  0xed   : > { %v397_v4 = vpop.f32.mrb[0].mxu0 }
  0xee   : > { %v403_v5 = vmul.f32 0.17677669, %v397_v4  ;;  %v1135_v6 = vpop.f32.mrb[1].mxu0 }
  0xef   : > { %v400_v7 = vpop.f32.mrb[2].mxu0 }
  0xf0   : > { %v1136_v8 = vpop.f32.mrb[3].mxu0  ;;  %v405_v9 = vsel %vm404_vm2, %v403_v5, -inf }
  0xf1   : > { %406 = vmax.xlane.f32.xlu0 %v405_v9 }
 0x17e   : > { %v407_v12 = vpop.xlane.xlu0 %406 }
 0x17f   : > { %v408_v13 = vsub.f32 %v403_v5, %v407_v12 }
 0x181   : > { %v409_v14 = vmul.f32 1.442695, %v408_v13 }
 0x183   : > { %1239 = vpow2.f32 %v409_v14 }
 0x18d   : > { %v1240_v15 = vpop.eup %1239 }
 0x18e   : > { %v411_v16 = vsel %vm404_vm2, %v1240_v15, 0.0 }
 0x18f   : > { %412 = vadd.xlane.f32.xlu0 %v411_v16 }
 0x1a5   : > { %587 = vrot.lane.b32.xlu0 %v1085_v10, %s1284_s14 }
 0x21c   : > { %v413_v21 = vpop.xlane.xlu0 %412 }
 0x21d   : > { %1241 = vrcp.f32 %v413_v21 }
 0x220   : > { %v588_v23 = vpop.permute.xlu0 %587 }
 0x221   : > { %v593_v24 = vsel %vm356_vm1, %v588_v23, 0 }
 0x222   : > { %1156 = vmatpush3.bf16.xpose.msra.mxu1 %v593_v24  ;;  %v1231_v24 = vld [vmem:[%s1487_s3] sm:$0xff]  }
 0x223   : > { %1167 = vmatprep.subr.bf16.mxu1 %v1281_v0 }
 0x227   : > { %v1242_v26 = vpop.eup %1241 }
 0x228   : > { %v415_v28 = vmul.f32 %v1242_v26, %v1240_v15  ;;  %v1233_v26 = vld [vmem:[%s1487_s3 + $0x10] sm:$0xff]  }
 0x229   : > { %1158 = vmatmul.mubr.msk.bf16.vlgmr.msra.gmra.mrb[0].mxu1 %vm356_vm1, %v586_v22 }
 0x22a   : > { %v416_v29 = vpack.c.bf16 %v415_v28, %v415_v28  ;;  %1168 = vmatpush3.bf16.xpose.msra.mxu1 %v705_v27  ;;  %1169 = vmatprep.mubr.msk.bf16.mxu1 %vm1282_vm0, %v1281_v0  ;;  %v1234_v27 = vld [vmem:[%s1487_s3 + $0x18] sm:$0xff]   ;;  %v1235_v28 = vld [vmem:[%s1487_s3 + $0x20] sm:$0xff]  }
 0x22b   : > { %1179 = vmatprep.subr.bf16.mxu1 %v1281_v0 }
 0x22c   : > { %1140 = vmatmul.mubr.msk.bf16.vlgmr.msra.gmra.mrb[4].mxu0 %vm404_vm2, %v416_v29  ;;  %v1236_v29 = vld [vmem:[%s1487_s3 + $0x28] sm:$0xff]  }
 0x22d   : > { %1144 = vmatpush3.bf16.xpose.msra.mxu0 %v481_v30  ;;  %1145 = vmatprep.mubr.msk.bf16.mxu0 %vm1282_vm0, %v1281_v0  ;;  %v1237_v30 = vld [vmem:[%s1487_s3 + $0x30] sm:$0xff]  }
 0x22e   : > { %1149 = vmatprep.subr.bf16.mxu0 %v1281_v0 }
 0x231   : > { %1170 = vmatmul.mubr.msk.bf16.vlgmr.msra.gmra.mrb[4].mxu1 %vm356_vm1, %v698_v31 }
 0x232   : > { %1195 = vmatprep.mubr.msk.bf16.mxu1 %vm1282_vm0, %v1281_v0  ;;  %1180 = vmatpush3.bf16.msra.mxu1 %v1231_v24 }
 0x233   : > { %1181 = vmatprep.subr.bf16.mxu1 %v1281_v0 }
 0x234   : > { %1146 = vmatmul.mubr.msk.bf16.vlgmr.msra.gmra.mrb[8].mxu0 %vm356_vm1, %v472_v20 }
 0x235   : > { %1151 = vmatprep.mubr.msk.bf16.mxu0 %vm1282_vm0, %v1281_v0 }
 0x236   : > { %1182 = vmatpush3.bf16.msra.mxu1 %v1232_v25 }
 0x237   : > { %1183 = vmatprep.subr.bf16.mxu1 %v1281_v0 }
 0x23a   : > { %1184 = vmatpush3.bf16.msra.mxu1 %v1233_v26 }
 0x23b   : > { %1185 = vmatprep.subr.bf16.mxu1 %v1281_v0 }
 0x23e   : > { %1186 = vmatpush3.bf16.msra.mxu1 %v1234_v27 }
 0x23f   : > { %1187 = vmatprep.subr.bf16.mxu1 %v1281_v0 }
 0x242   : > { %1188 = vmatpush3.bf16.msra.mxu1 %v1235_v28 }
 0x243   : > { %1189 = vmatprep.subr.bf16.mxu1 %v1281_v0 }
 0x246   : > { %1190 = vmatpush3.bf16.msra.mxu1 %v1236_v29 }
 0x247   : > { %1191 = vmatprep.subr.bf16.mxu1 %v1281_v0 }
 0x24a   : > { %1192 = vmatpush3.bf16.msra.mxu1 %v1237_v30 }
 0x24b   : > { %1193 = vmatprep.subr.bf16.mxu1 %v1281_v0 }
 0x2fc   : > { %v629_v32 = vpop.f32.mrb[0].mxu1 }
 0x2fd   : > { %v635_v33 = vmul.f32 0.17677669, %v629_v32  ;;  %v1159_v34 = vpop.f32.mrb[1].mxu1  ;;  %v1238_v32 = vld [vmem:[%s1487_s3 + $0x38] sm:$0xff]  }
 0x2fe   : > { %v632_v35 = vpop.f32.mrb[2].mxu1  ;;  %1194 = vmatpush3.bf16.msra.mxu1 %v1238_v32 }
 0x2ff   : > { %v1395_v36 = vpop.f32.mrb[4].mxu0  ;;  %v1160_v37 = vpop.f32.mrb[3].mxu1  ;;  %v636_v38 = vsel %vm404_vm2, %v635_v33, -inf }
 0x300   : > { %637 = vmax.xlane.f32.xlu0 %v636_v38  ;;  %v1141_v39 = vpop.f32.mrb[5].mxu0 }
 0x301   : > { %v464_v40 = vpop.f32.mrb[6].mxu0 }
 0x302   : > { %v1142_v41 = vpop.f32.mrb[7].mxu0 }
 0x304   : > { %v741_v42 = vpop.f32.mrb[4].mxu1 }
 0x305   : > { %v1171_v43 = vpop.f32.mrb[5].mxu1  ;;  %v747_v49 = vmul.f32 0.17677669, %v741_v42 }
 0x306   : > { %v744_v44 = vpop.f32.mrb[6].mxu1 }
 0x307   : > { %v517_v45 = vpop.f32.mrb[8].mxu0  ;;  %v1172_v46 = vpop.f32.mrb[7].mxu1  ;;  %v748_v53 = vsel %vm404_vm2, %v747_v49, -inf }
 0x308   : > { %v523_v47 = vmul.f32 0.17677669, %v517_v45  ;;  %v1147_v48 = vpop.f32.mrb[9].mxu0 }
 0x309   : > { %v520_v50 = vpop.f32.mrb[10].mxu0  ;;  %v467_v48 = vpack.c.bf16 %v1395_v36, %v1395_v36 }
 0x30a   : > { %v1148_v51 = vpop.f32.mrb[11].mxu0  ;;  %v524_v52 = vsel %vm404_vm2, %v523_v47, -inf }
 0x30b   : > { %525 = vmax.xlane.f32.xlu1 %v524_v52 }
 0x30f   : > { %749 = vmax.xlane.f32.xlu1 %v748_v53 }
 0x38d   : > { %v638_v54 = vpop.xlane.xlu0 %637 }
 0x38e   : > { %v639_v55 = vsub.f32 %v635_v33, %v638_v54  ;;  %v1092_v54 = vld [vmem:[%s1488_s4] ss:$0 sm:$0xff] }
 0x390   : > { %v640_v56 = vmul.f32 1.442695, %v639_v55 }
 0x392   : > { %1243 = vpow2.f32 %v640_v56  ;;  %v939_v56 = vld [vmem:[%s345_s16] sm:$0xff] }
 0x398   : > { %v526_v57 = vpop.xlane.xlu1 %525 }
 0x399   : > { %v527_v58 = vsub.f32 %v523_v47, %v526_v57 }
 0x39b   : > { %v528_v63 = vmul.f32 1.442695, %v527_v58 }
 0x39c   : > { %v1244_v59 = vpop.eup %1243  ;;  %v750_v60 = vpop.xlane.xlu1 %749 }
 0x39d   : > { %v751_v61 = vsub.f32 %v747_v49, %v750_v60  ;;  %v642_v62 = vsel %vm404_vm2, %v1244_v59, 0.0 }
 0x39e   : > { %643 = vadd.xlane.f32.xlu0 %v642_v62 }
 0x39f   : > { %v752_v1 = vmul.f32 1.442695, %v751_v61 }
 0x3a1   : > { %1245 = vpow2.f32 %v752_v1 }
 0x3a2   : > { %1247 = vpow2.f32 %v528_v63 }
 0x3ab   : > { %v1246_v2 = vpop.eup %1245 }
 0x3ac   : > { %v754_v3 = vsel %vm404_vm2, %v1246_v2, 0.0  ;;  %v1248_v4 = vpop.eup %1247 }
 0x3ad   : > { %755 = vadd.xlane.f32.xlu1 %v754_v3  ;;  %v530_v5 = vsel %vm404_vm2, %v1248_v4, 0.0 }
 0x3b1   : > { %531 = vadd.xlane.f32.xlu1 %v530_v5 }
 0x3b4   : > { %536 = vrot.lane.b32.xlu0 %v1371_v17, %s1283_s13 }
 0x3c2   : > { %648 = vrot.lane.b32.xlu1 %v1371_v17, %s1284_s14 }
 0x3c6   : > { %760 = vrot.lane.b32.xlu1 %v1371_v17, %s1285_s15 }
 0x42b   : > { %v644_v6 = vpop.xlane.xlu0 %643 }
 0x42f   : > { %v537_v7 = vpop.permute.xlu0 %536 }
 0x430   : > { %v542_v8 = vsel %vm423_vm3, %v537_v7, 0 }
 0x431   : > { %1150 = vmatpush3.bf16.msra.mxu0 %v542_v8  ;;  %v1102_v8 = vld [vmem:[%s1490_s6] ss:$0 sm:$0xff] }
 0x432   : > { %1161 = vmatprep.subr.bf16.mxu0 %v1281_v0 }
 0x43a   : > { %v756_v9 = vpop.xlane.xlu1 %755 }
 0x43e   : > { %v532_v10 = vpop.xlane.xlu1 %531 }
 0x43f   : > { %1249 = vrcp.f32 %v532_v10 }
 0x440   : > { %1251 = vrcp.f32 %v644_v6  ;;  %v1101_v6 = vld [vmem:[%s1489_s5] ss:$0 sm:$0xff] }
 0x441   : > { %1253 = vrcp.f32 %v756_v9 }
 0x442   : > { %v649_v12 = vpop.permute.xlu1 %648 }
 0x443   : > { %v654_v14 = vsel %vm423_vm3, %v649_v12, 0 }
 0x446   : > { %v761_v18 = vpop.permute.xlu1 %760 }
 0x447   : > { %v766_v19 = vsel %vm423_vm3, %v761_v18, 0 }
 0x449   : > { %v1250_v11 = vpop.eup %1249 }
 0x44a   : > { %v534_v13 = vmul.f32 %v1250_v11, %v1248_v4  ;;  %v1252_v16 = vpop.eup %1251 }
 0x44b   : > { %v646_v17 = vmul.f32 %v1252_v16, %v1244_v59  ;;  %v1254_v21 = vpop.eup %1253 }
 0x44c   : > { %v535_v15 = vpack.c.bf16 %v534_v13, %v534_v13  ;;  %v758_v22 = vmul.f32 %v1254_v21, %v1246_v2 }
 0x44d   : > { %v647_v20 = vpack.c.bf16 %v646_v17, %v646_v17 }
 0x44e   : > { %1152 = vmatmul.mubr.msk.bf16.vlgmr.msra.gmra.mrb[12].mxu0 %vm404_vm2, %v535_v15  ;;  %v759_v23 = vpack.c.bf16 %v758_v22, %v758_v22 }
 0x44f   : > { %1162 = vmatpush3.bf16.msra.mxu0 %v654_v14  ;;  %1163 = vmatprep.mubr.msk.bf16.mxu0 %vm1282_vm0, %v1281_v0 }
 0x450   : > { %1173 = vmatprep.subr.bf16.mxu0 %v1281_v0 }
 0x456   : > { %1164 = vmatmul.mubr.msk.bf16.vlgmr.msra.gmra.mrb[16].mxu0 %vm404_vm2, %v647_v20 }
 0x457   : > { %1174 = vmatpush3.bf16.msra.mxu0 %v766_v19  ;;  %1175 = vmatprep.mubr.msk.bf16.mxu0 %vm1282_vm0, %v1281_v0 }
 0x45e   : > { %1176 = vmatmul.mubr.msk.bf16.vlgmr.msra.gmra.mrb[20].mxu0 %vm404_vm2, %v759_v23 }
 0x521   : > { %v578_v31 = vpop.f32.mrb[12].mxu0 }
 0x522   : > { %v584_v33 = vpack.c.bf16 %v578_v31, %v578_v31  ;;  %v1153_v34 = vpop.f32.mrb[13].mxu0 }
 0x523   : > { %v581_v35 = vpop.f32.mrb[14].mxu0 }
 0x524   : > { %810 = vrot.lane.b32.xlu0 %v584_v33, %s1285_s15  ;;  %v1154_v37 = vpop.f32.mrb[15].mxu0 }
 0x529   : > { %v690_v38 = vpop.f32.mrb[16].mxu0 }
 0x52a   : > { %v696_v39 = vpack.c.bf16 %v690_v38, %v690_v38  ;;  %v1165_v40 = vpop.f32.mrb[17].mxu0 }
 0x52b   : > { %v693_v41 = vpop.f32.mrb[18].mxu0 }
 0x52c   : > { %813 = vrot.lane.b32.xlu1 %v696_v39, %s1284_s14  ;;  %v1166_v42 = vpop.f32.mrb[19].mxu0 }
 0x531   : > { %v802_v43 = vpop.f32.mrb[20].mxu0 }
 0x532   : > { %v808_v44 = vpack.c.bf16 %v802_v43, %v802_v43  ;;  %v1177_v45 = vpop.f32.mrb[21].mxu0 }
 0x533   : > { %v805_v46 = vpop.f32.mrb[22].mxu0 }
 0x534   : > { %816 = vrot.lane.b32.xlu0 %v808_v44, %s1283_s13  ;;  %v1178_v0 = vpop.f32.mrb[23].mxu0 }
 0x596   : > { %v811_v47 = vpop.permute.xlu0 %810 }
 0x597   : > { %v820_v50 = vsel %vm356_vm1, %v467_v48, %v811_v47 }
 0x59e   : > { %v814_v49 = vpop.permute.xlu1 %813 }
 0x59f   : > { %v823_v51 = vsel %vm821_vm4, %v820_v50, %v814_v49 }
 0x5a6   : > { %v817_v52 = vpop.permute.xlu0 %816 }
 0x5a7   : > { %v826_v53 = vsel %vm824_vm5, %v823_v51, %v817_v52 }
 0x5a8   : > { %1196 = vmatmul.mubr.bf16.vlgmr.msra.gmra.mrb[8].mxu1 %v826_v53 }
 0x67b   : > { %v933_v55 = vpop.f32.mrb[8].mxu1 }
 0x67c   : > { %v934_v36 = vadd.f32 %v1092_v54, %v933_v55  ;;  %v1197_v57 = vpop.f32.mrb[9].mxu1 }
 0x67d   : > { %v936_v58 = vpop.f32.mrb[10].mxu1 }
 0x67e   : > { %v1198_v59 = vpop.f32.mrb[11].mxu1  ;;  %v940_v60 = vadd.f32 %v939_v56, %v934_v36 }
 0x680   : > { %941 = vadd.xlane.f32.xlu1 %v940_v60 }
 0x70d   : > { %v942_v61 = vpop.xlane.xlu1 %941 }
 0x70e   : > { %v944_v62 = vmul.f32 0.0078125, %v942_v61 }
 0x710   : > { %v945_v63 = vsub.f32 %v940_v60, %v944_v62 }
 0x712   : > { %v946_v1 = vmul.f32 %v945_v63, %v945_v63 }
 0x714   : > { %947 = vadd.xlane.f32.xlu0 %v946_v1 }
 0x7a1   : > { %v948_v2 = vpop.xlane.xlu0 %947 }
 0x7a2   : > { %v949_v3 = vmul.f32 0.0078125, %v948_v2 }
 0x7a4   : > { %v950_v4 = vadd.f32 1e-05, %v949_v3 }
 0x7a6   : > { %1255 = vrsqrt.f32 %v950_v4 }
 0x7b0   : > { %v1256_v5 = vpop.eup %1255 }
 0x7b1   : > { %v952_v7 = vmul.f32 %v1256_v5, %v945_v63 }
 0x7b3   : > { %v960_v9 = vmul.f32 %v1101_v6, %v952_v7 }
 0x7b5   : > { %v968_v10 = vadd.f32 %v1102_v8, %v960_v9 }
 0x7b7   : > { %969 = vst [vmem:[%s352_s24] sm:$0xff] %v968_v10 }
 0x7b8 PF: > { %s17_s26 = sadd.s32 1, %s1279_s26   ;;  %s1492_s24 = smov %s1275_s25 }
 0x7b9   : > { %p14_p5 = scmp.ge.s32.totalorder %s17_s26, 4   ;;  %s1493_s25 = smov %s1495_s27 }
 0x7bb   :  { %16 = sbr.rel (!%p14_p5) target bundleno = 2 (0x2), region = 84 }

// kernel: span_attention_layer.9
= control target key start
LH: loop header
LB: loop body
LE: loop exit
PB: predicated region body
PF: predicated region fallthrough
CT: control target
= control target key end

     0   :  { %v279_v1 = vmov 0   ;;  %v39_v23 = vlaneseq  ;;  %s375_s1 = inlined_call_operand.vmem [shape: bf16[128,256], index: 1, kind: input, shape index: {}]   ;;  %s376_s0 = inlined_call_operand.vmem [shape: f32[32,128], index: 0, kind: input, shape index: {}]   ;;  %s377_s2 = inlined_call_operand.vmem [shape: f32[1,256], index: 2, kind: input, shape index: {}]   ;;  %s378_s3 = inlined_call_operand.vmem [shape: bf16[32,256], index: 3, kind: output, shape index: {}]  }
   0x1   :  { %v255_v0 = vld [vmem:[%s375_s1 + $0x4] ss:$8 sps:$4 sm:$0xff]   ;;  %161 = vmatprep.mubr.bf16.mxu0 %v279_v1  ;;  %171 = vmatprep.mubr.bf16.mxu1 %v279_v1  ;;  %v257_v2 = vld [vmem:[%s375_s1] ss:$8 sps:$4 sm:$0xff]   ;;  %v258_v3 = vld [vmem:[%s375_s1 + $0x14] ss:$8 sps:$4 sm:$0xff]  }
   0x2   :  { %129 = vmatprep.subr.bf16.mxu0 %v255_v0  ;;  %238 = vmatprep.subr.bf16.mxu1 %v255_v0  ;;  %v260_v4 = vld [vmem:[%s375_s1 + $0x10] ss:$8 sps:$4 sm:$0xff]   ;;  %v261_v5 = vld [vmem:[%s375_s1 + $0x24] ss:$8 sps:$4 sm:$0xff]   ;;  %v263_v6 = vld [vmem:[%s375_s1 + $0x20] ss:$8 sps:$4 sm:$0xff]  }
   0x3   :  { %130 = vmatpush1.bf16.msra.mxu0 %v257_v2  ;;  %246 = vmatpush1.bf16.msra.mxu1 %v257_v2  ;;  %v264_v7 = vld [vmem:[%s375_s1 + $0x34] ss:$8 sps:$4 sm:$0xff]   ;;  %v266_v8 = vld [vmem:[%s375_s1 + $0x30] ss:$8 sps:$4 sm:$0xff]   ;;  %v267_v9 = vld [vmem:[%s375_s1 + $0x44] ss:$8 sps:$4 sm:$0xff]  }
   0x4   :  { %131 = vmatprep.subr.bf16.mxu0 %v258_v3  ;;  %239 = vmatprep.subr.bf16.mxu1 %v258_v3  ;;  %v269_v10 = vld [vmem:[%s375_s1 + $0x40] ss:$8 sps:$4 sm:$0xff]   ;;  %v270_v11 = vld [vmem:[%s375_s1 + $0x54] ss:$8 sps:$4 sm:$0xff]   ;;  %v272_v12 = vld [vmem:[%s375_s1 + $0x50] ss:$8 sps:$4 sm:$0xff]  }
   0x5   :  { %v273_v13 = vld [vmem:[%s375_s1 + $0x64] ss:$8 sps:$4 sm:$0xff]   ;;  %v275_v14 = vld [vmem:[%s375_s1 + $0x60] ss:$8 sps:$4 sm:$0xff]   ;;  %v276_v15 = vld [vmem:[%s375_s1 + $0x74] ss:$8 sps:$4 sm:$0xff]  }
   0x6   :  { %v278_v16 = vld [vmem:[%s375_s1 + $0x70] ss:$8 sps:$4 sm:$0xff]   ;;  %v15_v17 = vld [vmem:[%s376_s0] sm:$0xff]  ;;  %v16_v18 = vld [vmem:[%s376_s0 + $0x8] sm:$0xff]  ;;  %v40_v24 = vshrl.u32 %v39_v23, 7 }
   0x7   :  { %132 = vmatpush1.bf16.msra.mxu0 %v260_v4  ;;  %247 = vmatpush1.bf16.msra.mxu1 %v260_v4  ;;  %v17_v19 = vld [vmem:[%s376_s0 + $0x10] sm:$0xff]  ;;  %v18_v20 = vld [vmem:[%s376_s0 + $0x18] sm:$0xff]  ;;  %v19_v21 = vpack.c.bf16 %v16_v18, %v15_v17  ;;  %v37_v26 = vld [vmem:[%s377_s2] sm:$0x3] }
   0x8   :  { %133 = vmatprep.subr.bf16.mxu0 %v261_v5  ;;  %240 = vmatprep.subr.bf16.mxu1 %v261_v5  ;;  %v20_v22 = vpack.c.bf16 %v18_v20, %v17_v19  ;;  %v41_v25 = vsub.s32 0, %v40_v24  ;;  %v45_v27 = vsub.s32 1, %v40_v24 }
   0xa   :  { %v42_v28 = vrot.slane %v37_v26, %v41_v25  ;;  %v46_v29 = vrot.slane %v37_v26, %v45_v27 }
   0xb   :  { %134 = vmatpush1.bf16.msra.mxu0 %v263_v6  ;;  %248 = vmatpush1.bf16.msra.mxu1 %v263_v6 }
   0xc   :  { %135 = vmatprep.subr.bf16.mxu0 %v264_v7  ;;  %241 = vmatprep.subr.bf16.mxu1 %v264_v7 }
   0xf   :  { %136 = vmatpush1.bf16.msra.mxu0 %v266_v8  ;;  %249 = vmatpush1.bf16.msra.mxu1 %v266_v8 }
  0x10   :  { %137 = vmatprep.subr.bf16.mxu0 %v267_v9  ;;  %242 = vmatprep.subr.bf16.mxu1 %v267_v9 }
  0x13   :  { %138 = vmatpush1.bf16.msra.mxu0 %v269_v10  ;;  %250 = vmatpush1.bf16.msra.mxu1 %v269_v10 }
  0x14   :  { %139 = vmatprep.subr.bf16.mxu0 %v270_v11  ;;  %243 = vmatprep.subr.bf16.mxu1 %v270_v11 }
  0x17   :  { %140 = vmatpush1.bf16.msra.mxu0 %v272_v12  ;;  %251 = vmatpush1.bf16.msra.mxu1 %v272_v12 }
  0x18   :  { %141 = vmatprep.subr.bf16.mxu0 %v273_v13  ;;  %244 = vmatprep.subr.bf16.mxu1 %v273_v13 }
  0x1b   :  { %142 = vmatpush1.bf16.msra.mxu0 %v275_v14  ;;  %252 = vmatpush1.bf16.msra.mxu1 %v275_v14 }
  0x1c   :  { %143 = vmatprep.subr.bf16.mxu0 %v276_v15  ;;  %245 = vmatprep.subr.bf16.mxu1 %v276_v15 }
  0x1f   :  { %144 = vmatpush1.bf16.msra.mxu0 %v278_v16  ;;  %253 = vmatpush1.bf16.msra.mxu1 %v278_v16 }
  0x22   :  { %162 = vmatmul.mubr.bf16.vlgmr.msra.gmra.mrb[0].mxu0 %v19_v21  ;;  %172 = vmatmul.mubr.bf16.vlgmr.msra.gmra.mrb[0].mxu1 %v20_v22 }
  0xf5   :  { %v163_v30 = vpop.f32.mrb[0].mxu0  ;;  %v173_v31 = vpop.f32.mrb[0].mxu1 }
  0xf6   :  { %v164_v32 = vadd.f32 %v163_v30, %v42_v28  ;;  %v174_v33 = vadd.f32 %v173_v31, %v42_v28  ;;  %v165_v34 = vpop.f32.mrb[1].mxu0  ;;  %v175_v35 = vpop.f32.mrb[1].mxu1 }
  0xf7   :  { %v166_v36 = vadd.f32 %v165_v34, %v46_v29  ;;  %v176_v37 = vadd.f32 %v175_v35, %v46_v29  ;;  %v167_v38 = vpop.f32.mrb[2].mxu0  ;;  %v177_v39 = vpop.f32.mrb[2].mxu1 }
  0xf8   :  { %v168_v40 = vadd.f32 %v167_v38, %v42_v28  ;;  %v178_v41 = vadd.f32 %v177_v39, %v42_v28  ;;  %v169_v42 = vpop.f32.mrb[3].mxu0  ;;  %v179_v43 = vpop.f32.mrb[3].mxu1 }
  0xf9   :  { %v234_v44 = vpack.c.bf16 %v166_v36, %v164_v32  ;;  %v236_v45 = vpack.c.bf16 %v176_v37, %v174_v33  ;;  %v170_v46 = vadd.f32 %v169_v42, %v46_v29  ;;  %v180_v47 = vadd.f32 %v179_v43, %v46_v29 }
  0xfb   :  { %206 = vst [vmem:[%s378_s3] sm:$0xff] %v234_v44  ;;  %208 = vst [vmem:[%s378_s3 + $0x10] sm:$0xff] %v236_v45  ;;  %v235_v48 = vpack.c.bf16 %v170_v46, %v168_v40  ;;  %v237_v49 = vpack.c.bf16 %v180_v47, %v178_v41 }
  0xfd   :  { %207 = vst [vmem:[%s378_s3 + $0x8] sm:$0xff] %v235_v48  ;;  %209 = vst [vmem:[%s378_s3 + $0x18] sm:$0xff] %v237_v49 }

// kernel: span_attention_layer.11
= control target key start
LH: loop header
LB: loop body
LE: loop exit
PB: predicated region body
PF: predicated region fallthrough
CT: control target
= control target key end

     0   :  { %v554_v2 = vmov 0   ;;  %s724_s0 = inlined_call_operand.vmem [shape: f32[16,128], index: 0, kind: input, shape index: {}]   ;;  %s725_s1 = inlined_call_operand.vmem [shape: bf16[128,256], index: 1, kind: input, shape index: {}]   ;;  %s726_s2 = inlined_call_operand.vmem [shape: f32[1,256], index: 2, kind: input, shape index: {}]   ;;  %s727_s3 = inlined_call_operand.vmem [shape: bf16[256,128], index: 3, kind: input, shape index: {}]   ;;  %s728_s4 = inlined_call_operand.vmem [shape: f32[1,128], index: 4, kind: input, shape index: {}]   ;;  %s729_s5 = inlined_call_operand.vmem [shape: f32[1,128], index: 5, kind: input, shape index: {}]   ;;  %s730_s6 = inlined_call_operand.vmem [shape: f32[1,128], index: 6, kind: input, shape index: {}]   ;;  %s731_s7 = inlined_call_operand.hbm [shape: f32[16,128], index: 7, kind: output, shape index: {}]  }
   0x1   :  { %v486_v0 = vld [vmem:[%s725_s1 + $0x4] ss:$8 sps:$4 sm:$0xff]   ;;  %v488_v1 = vld [vmem:[%s725_s1] ss:$8 sps:$4 sm:$0xff]   ;;  %171 = vmatprep.mubr.bf16.mxu0 %v554_v2  ;;  %v489_v3 = vld [vmem:[%s725_s1 + $0x14] ss:$8 sps:$4 sm:$0xff]  }
   0x2   :  { %139 = vmatprep.subr.bf16.mxu0 %v486_v0  ;;  %v491_v4 = vld [vmem:[%s725_s1 + $0x10] ss:$8 sps:$4 sm:$0xff]   ;;  %v492_v5 = vld [vmem:[%s725_s1 + $0x24] ss:$8 sps:$4 sm:$0xff]   ;;  %v494_v6 = vld [vmem:[%s725_s1 + $0x20] ss:$8 sps:$4 sm:$0xff]  }
   0x3   :  { %140 = vmatpush1.bf16.msra.mxu0 %v488_v1  ;;  %v495_v7 = vld [vmem:[%s725_s1 + $0x34] ss:$8 sps:$4 sm:$0xff]   ;;  %v497_v8 = vld [vmem:[%s725_s1 + $0x30] ss:$8 sps:$4 sm:$0xff]   ;;  %v498_v9 = vld [vmem:[%s725_s1 + $0x44] ss:$8 sps:$4 sm:$0xff]  }
   0x4   :  { %141 = vmatprep.subr.bf16.mxu0 %v489_v3  ;;  %v510_v10 = vld [vmem:[%s727_s3 + $0x40] sm:$0xff]   ;;  %v501_v13 = vld [vmem:[%s725_s1 + $0x54] ss:$8 sps:$4 sm:$0xff]   ;;  %v512_v14 = vld [vmem:[%s727_s3 + $0x48] sm:$0xff]  }
   0x5   :  { %v500_v11 = vld [vmem:[%s725_s1 + $0x40] ss:$8 sps:$4 sm:$0xff]   ;;  %460 = vmatprep.subr.bf16.mxu1 %v510_v10  ;;  %v514_v16 = vld [vmem:[%s727_s3 + $0x50] sm:$0xff]   ;;  %v504_v18 = vld [vmem:[%s725_s1 + $0x64] ss:$8 sps:$4 sm:$0xff]  }
   0x6   :  { %v511_v12 = vld [vmem:[%s727_s3] sm:$0xff]   ;;  %v513_v15 = vld [vmem:[%s727_s3 + $0x8] sm:$0xff]   ;;  %v503_v17 = vld [vmem:[%s725_s1 + $0x50] ss:$8 sps:$4 sm:$0xff]  }
   0x7   :  { %142 = vmatpush1.bf16.msra.mxu0 %v491_v4  ;;  %461 = vmatpush3.bf16.msra.mxu1 %v511_v12  ;;  %v515_v19 = vld [vmem:[%s727_s3 + $0x10] sm:$0xff]   ;;  %v516_v20 = vld [vmem:[%s727_s3 + $0x58] sm:$0xff]   ;;  %v506_v21 = vld [vmem:[%s725_s1 + $0x60] ss:$8 sps:$4 sm:$0xff]  }
   0x8   :  { %143 = vmatprep.subr.bf16.mxu0 %v492_v5  ;;  %462 = vmatprep.subr.bf16.mxu1 %v512_v14  ;;  %v507_v22 = vld [vmem:[%s725_s1 + $0x74] ss:$8 sps:$4 sm:$0xff]   ;;  %v518_v24 = vld [vmem:[%s727_s3 + $0x60] sm:$0xff]   ;;  %v509_v25 = vld [vmem:[%s725_s1 + $0x70] ss:$8 sps:$4 sm:$0xff]  }
   0x9   :  { %v517_v23 = vld [vmem:[%s727_s3 + $0x18] sm:$0xff]  }
   0xb   :  { %144 = vmatpush1.bf16.msra.mxu0 %v494_v6  ;;  %463 = vmatpush3.bf16.msra.mxu1 %v513_v15 }
   0xc   :  { %145 = vmatprep.subr.bf16.mxu0 %v495_v7  ;;  %464 = vmatprep.subr.bf16.mxu1 %v514_v16 }
   0xf   :  { %146 = vmatpush1.bf16.msra.mxu0 %v497_v8  ;;  %465 = vmatpush3.bf16.msra.mxu1 %v515_v19 }
  0x10   :  { %147 = vmatprep.subr.bf16.mxu0 %v498_v9  ;;  %466 = vmatprep.subr.bf16.mxu1 %v516_v20 }
  0x13   :  { %148 = vmatpush1.bf16.msra.mxu0 %v500_v11 }
  0x14   :  { %149 = vmatprep.subr.bf16.mxu0 %v501_v13 }
  0x17   :  { %150 = vmatpush1.bf16.msra.mxu0 %v503_v17 }
  0x18   :  { %151 = vmatprep.subr.bf16.mxu0 %v504_v18 }
  0x19   :  { %12 = vsyncpa [#allocation3], 0  ;;  %v28_v26 = vld [vmem:[%s724_s0] sm:$0xff]  ;;  %v29_v27 = vld [vmem:[%s724_s0 + $0x8] sm:$0xff]  ;;  %467 = vmatpush3.bf16.msra.mxu1 %v517_v23  ;;  %v49_v36 = vlaneseq  ;;  %s555_s26 = smov [#allocation2]  }
  0x1a   :  { %v519_v28 = vld [vmem:[%s727_s3 + $0x20] sm:$0xff]   ;;  %468 = vmatprep.subr.bf16.mxu1 %v518_v24  ;;  %v520_v29 = vld [vmem:[%s727_s3 + $0x68] sm:$0xff]   ;;  %v30_v30 = vpack.c.bf16 %v29_v27, %v28_v26  ;;  %v522_v32 = vld [vmem:[%s727_s3 + $0x70] sm:$0xff]   ;;  %s414_s27 = sshll.u32 %s555_s26, 4  ;;  %s415_s27 = int_to_ptr.vmem [resolvable:$true] %s414_s27 }
  0x1b   :  { %152 = vmatpush1.bf16.msra.mxu0 %v506_v21  ;;  %v521_v31 = vld [vmem:[%s727_s3 + $0x28] sm:$0xff]   ;;  %v523_v33 = vld [vmem:[%s727_s3 + $0x30] sm:$0xff]   ;;  %v524_v34 = vld [vmem:[%s727_s3 + $0x78] sm:$0xff]   ;;  %v50_v37 = vshrl.u32 %v49_v36, 7  ;;  %s530_s28 = scalar_lea.vmem %s415_s27, 256  ;;  %p535_p1 = scmp.lt.s32.totalorder %s415_s27, %s415_s27 }
  0x1c   :  { %153 = vmatprep.subr.bf16.mxu0 %v507_v22  ;;  %v525_v35 = vld [vmem:[%s727_s3 + $0x38] sm:$0xff]   ;;  %v47_v39 = vld [vmem:[%s726_s2] sm:$0x3]  ;;  %p531_p0 = scmp.ne.s32.totalorder %s415_s27, %s530_s28  ;;  %p536_p2 = scmp.lt.s32.totalorder %s530_s28, %s530_s28 }
  0x1d   :  { %469 = vmatpush3.bf16.msra.mxu1 %v519_v28  ;;  %v51_v38 = vsub.s32 0, %v50_v37  ;;  %v55_v40 = vsub.s32 1, %v50_v37  ;;  %v441_v58 = vld [vmem:[%s728_s4] ss:$0 sm:$0xff] }
  0x1e   :  { %470 = vmatprep.subr.bf16.mxu1 %v520_v29  ;;  %v458_v19 = vld [vmem:[%s729_s5] ss:$0 sm:$0xff]  ;;  %p537_p3 = por %p536_p2, %p535_p1 }
  0x1f   :  { %154 = vmatpush1.bf16.msra.mxu0 %v509_v25  ;;  %v52_v41 = vrot.slane %v47_v39, %v51_v38  ;;  %v56_v42 = vrot.slane %v47_v39, %v55_v40  ;;  %v459_v21 = vld [vmem:[%s730_s6] ss:$0 sm:$0xff] }
  0x20   :  { %p538_p4 = pnand %p537_p3, %p531_p0 }
  0x21   :  { %471 = vmatpush3.bf16.msra.mxu1 %v521_v31 }
  0x22   :  { %172 = vmatmul.mubr.bf16.vlgmr.msra.gmra.mrb[0].mxu0 %v30_v30  ;;  %472 = vmatprep.subr.bf16.mxu1 %v522_v32 }
  0x25   :  { %473 = vmatpush3.bf16.msra.mxu1 %v523_v33 }
  0x26   :  { %474 = vmatprep.subr.bf16.mxu1 %v524_v34 }
  0x29   :  { %475 = vmatpush3.bf16.msra.mxu1 %v525_v35 }
  0xf5   :  { %v173_v43 = vpop.f32.mrb[0].mxu0 }
  0xf6   :  { %v174_v44 = vadd.f32 %v173_v43, %v52_v41  ;;  %v175_v45 = vpop.f32.mrb[1].mxu0 }
  0xf7   :  { %v176_v46 = vadd.f32 %v175_v45, %v56_v42  ;;  %v177_v47 = vpop.f32.mrb[2].mxu0 }
  0xf8   :  { %v178_v48 = vadd.f32 %v177_v47, %v52_v41  ;;  %v179_v49 = vpop.f32.mrb[3].mxu0  ;;  %v182_v51 = vmax.f32 %v174_v44, 0.0 }
  0xf9   :  { %v180_v50 = vadd.f32 %v179_v49, %v56_v42  ;;  %v183_v53 = vmax.f32 %v176_v46, 0.0 }
  0xfa   :  { %v184_v52 = vmax.f32 %v178_v48, 0.0 }
  0xfb   :  { %v185_v54 = vmax.f32 %v180_v50, 0.0 }
  0xfc   :  { %v186_v55 = vpack.c.bf16 %v184_v52, %v182_v51 }
  0xfd   :  { %v187_v56 = vpack.c.bf16 %v185_v54, %v183_v53 }
  0xff   :  { %355 = vmatprep.mubr.bf16.mxu1 %v187_v56 }
 0x100   :  { %356 = vmatmul.mubr.bf16.vlgmr.msra.gmra.mrb[0].mxu1 %v186_v55 }
 0x1d3   :  { %v476_v57 = vpop.f32.mrb[0].mxu1 }
 0x1d4   :  { %v477_v59 = vpop.f32.mrb[1].mxu1 }
 0x1d5   :  { %v478_v60 = vadd.f32 %v477_v59, %v476_v57  ;;  %v479_v61 = vpop.f32.mrb[2].mxu1 }
 0x1d6   :  { %v480_v62 = vpop.f32.mrb[3].mxu1 }
 0x1d7   :  { %v358_v63 = vadd.f32 %v478_v60, %v441_v58  ;;  %v481_v0 = vadd.f32 %v480_v62, %v479_v61 }
 0x1d9   :  { %v361_v1 = vadd.f32 %v481_v0, %v441_v58  ;;  %v364_v2 = vadd.f32 %v358_v63, %v28_v26 }
 0x1db   :  { %366 = vadd.xlane.f32.xlu0 %v364_v2  ;;  %v365_v3 = vadd.f32 %v361_v1, %v29_v27 }
 0x1df   :  { %368 = vadd.xlane.f32.xlu0 %v365_v3 }
 0x268   :  { %v367_v4 = vpop.xlane.xlu0 %366 }
 0x269   :  { %v371_v5 = vmul.f32 0.0078125, %v367_v4 }
 0x26b   :  { %v373_v6 = vsub.f32 %v364_v2, %v371_v5 }
 0x26c   :  { %v369_v7 = vpop.xlane.xlu0 %368 }
 0x26d   :  { %v372_v8 = vmul.f32 0.0078125, %v369_v7  ;;  %v375_v9 = vmul.f32 %v373_v6, %v373_v6 }
 0x26f   :  { %v374_v10 = vsub.f32 %v365_v3, %v372_v8  ;;  %377 = vadd.xlane.f32.xlu1 %v375_v9 }
 0x271   :  { %v376_v11 = vmul.f32 %v374_v10, %v374_v10 }
 0x273   :  { %379 = vadd.xlane.f32.xlu1 %v376_v11 }
 0x2fc   :  { %v378_v12 = vpop.xlane.xlu1 %377 }
 0x2fd   :  { %v381_v13 = vmul.f32 0.0078125, %v378_v12 }
 0x2ff   :  { %v383_v14 = vadd.f32 1e-05, %v381_v13 }
 0x300   :  { %v380_v15 = vpop.xlane.xlu1 %379 }
 0x301   :  { %526 = vrsqrt.f32 %v383_v14  ;;  %v382_v16 = vmul.f32 0.0078125, %v380_v15 }
 0x303   :  { %v384_v17 = vadd.f32 1e-05, %v382_v16 }
 0x305   :  { %528 = vrsqrt.f32 %v384_v17 }
 0x30b   :  { %v527_v18 = vpop.eup %526 }
 0x30c   :  { %v387_v20 = vmul.f32 %v527_v18, %v373_v6 }
 0x30e   :  { %v396_v22 = vmul.f32 %v458_v19, %v387_v20 }
 0x30f   :  { %v529_v23 = vpop.eup %528 }
 0x310   :  { %v388_v24 = vmul.f32 %v529_v23, %v374_v10  ;;  %v405_v25 = vadd.f32 %v459_v21, %v396_v22 }
 0x312   :  { %v397_v26 = vmul.f32 %v458_v19, %v388_v24  ;;  %407 = vst [vmem:[#allocation2] sm:$0xff] %v405_v25 }
 0x314   :  { %v406_v27 = vadd.f32 %v459_v21, %v397_v26 }
 0x316   :  { %408 = vst [vmem:[#allocation2 + $0x8] sm:$0xff] %v406_v27 }
 0x317   :  { %541 = shalt.err (!%p538_p4)
}
 0x318   :  { %s542_s29 = scalar_lea.hbm %s731_s7, 256 }
 0x319   :  { %p543_p5 = scmp.ne.s32.totalorder %s731_s7, %s542_s29  ;;  %p546_p6 = scmp.lt.u32.totalorder %s542_s29, %s731_s7 }
 0x31b   :  { %p548_p7 = pnand %p546_p6, %p543_p5 }
 0x31d   :  { %551 = shalt.err (!%p548_p7)
}
 0x31e   :  { %s556_s11 = smov 128   ;;  %s557_s12 = smov 8  }
 0x31f   :  { %420 = dma.vmem_to_hbm [thread:$0]  %s415_s27, 256, %s731_s7, [#allocation3], %s556_s11, %s556_s11, %s557_s12  }
 0x320   :  { %552 = dma.done.wait [#allocation3], 256  }
 0x321   :  { %553 = vsyncadd [#allocation3], 4294967040 }
 0x322   :  { %424 = vsyncpa [#allocation3], 1 }

// kernel: span_attention_layer.10
= control target key start
LH: loop header
LB: loop body
LE: loop exit
PB: predicated region body
PF: predicated region fallthrough
CT: control target
= control target key end

     0   :  { %s1389_s27 = smov 0   ;;  %s1391_s28 = smov 0   ;;  %s1557_s0 = inlined_call_operand.vmem [shape: bf16[2,8,128], index: 0, kind: input, shape index: {}]   ;;  %s1558_s1 = inlined_call_operand.vmem [shape: bf16[2,16,256], index: 1, kind: input, shape index: {}]   ;;  %s1559_s2 = inlined_call_operand.vmem [shape: f32[2,1,16], index: 2, kind: input, shape index: {}]   ;;  %s1560_s3 = inlined_call_operand.vmem [shape: f32[2,8,128], index: 3, kind: input, shape index: {}]   ;;  %s1561_s4 = inlined_call_operand.vmem [shape: bf16[128,128], index: 4, kind: input, shape index: {}]   ;;  %s1562_s5 = inlined_call_operand.vmem [shape: f32[1,128], index: 5, kind: input, shape index: {}]   ;;  %s1563_s6 = inlined_call_operand.vmem [shape: f32[1,128], index: 6, kind: input, shape index: {}]   ;;  %s1564_s7 = inlined_call_operand.vmem [shape: f32[1,128], index: 7, kind: input, shape index: {}]   ;;  %s1565_s8 = inlined_call_operand.vmem [shape: f32[2,8,128], index: 8, kind: output, shape index: {}]  }
   0x1   :  { %s1393_s29 = smov 0  }
   0x2 LB: > { %s30_s30 = sadd.s32 1, %s1333_s28  ;;  %p1131_p0 = scmp.ge.s32.totalorder %s1337_s29, 1  ;;  %s1337_s29 = sphi %s1393_s29, %s18_s29   ;;  %s1333_s28 = sphi %s1391_s28, %s1567_s28   ;;  %s1329_s27 = sphi %s1389_s27, %s1566_s27  }
   0x3   : > { %p32_p1 = scmp.ge.s32.totalorder %s30_s30, 2  ;;  %p312_p2 = scmp.lt.s32.totalorder %s1337_s29, 3 }
   0x5   : > { %s1569_s30 = smov (%p32_p1, %s30_s30), 0  ;;  %p313_p3 = pnand %p1131_p0, %p312_p2 }
   0x6   : > { %p365_p4 = scmp.lt.s32.totalorder (!%p313_p3), %s1329_s27, 1  ;;  %v1339_v0 = vmov (!%p313_p3), 0.0   ;;  %vm1340_vm0 = vmmov (!%p313_p3), 0   ;;  %vm404_vm1 = vcmask (!%p313_p3), 261120   ;;  %vm459_vm2 = vcmask (!%p313_p3), 130048   ;;  %s1341_s20 = smov (!%p313_p3), 96  }
   0x7   : > { %316 = sbr.rel (%p313_p3) target bundleno = 1980 (0x7bc), region = 52  ;;  %1188 = vmatprep.subr.bf16.mxu0 (!%p313_p3), %v1339_v0  ;;  %1190 = vmatprep.mubr.msk.bf16.mxu0 (!%p313_p3), %vm1340_vm0, %v1339_v0  ;;  %s1342_s21 = smov (!%p313_p3), 64   ;;  %vm868_vm3 = vcmask (!%p313_p3), 523264   ;;  %vm871_vm4 = vcmask (!%p313_p3), 785408  }
   0x8   : > { %1212 = vmatprep.subr.bf16.mxu1 (!%p313_p3), %v1339_v0  ;;  %1214 = vmatprep.mubr.msk.bf16.mxu1 (!%p313_p3), %vm1340_vm0, %v1339_v0  ;;  %s1343_s22 = smov (!%p313_p3), 32  }
   0xe   : > { %s1571_s27 = smov (!%p365_p4, %s1329_s27), 1 }
   0xf   : > { %s1162_s9 = sshll.u32 %s1571_s27, 4  ;;  %s1132_s13 = sshll.u32 %s1571_s27, 2 }
  0x10   : > { %s1419_s12 = scalar_lea.vmem %s1558_s1, %s1162_s9  ;;  %s371_s16 = scalar_lea.vmem %s1557_s0, %s1132_s13 }
  0x11   : > { %v1285_v1 = vld [vmem:[%s1419_s12] ss:$8 sps:$4 sm:$0xff]   ;;  %s379_s19 = scalar_lea.vmem %s1559_s2, %s1571_s27  ;;  %v1446_v18 = vld [vmem:[%s1419_s12 + $0x4] ss:$8 sps:$4 sm:$0xff]  }
  0x12   : > { %v409_v2 = vsel %vm404_vm1, %v1285_v1, 0  ;;  %v395_v3 = vld [vmem:[%s371_s16] sm:$0xf]  ;;  %525 = vrot.lane.b32.xlu1 %v1285_v1, %s1341_s20 }
  0x13   : > { %1189 = vmatpush3.bf16.xpose.msra.mxu0 %v409_v2  ;;  %v1435_v5 = vld [vmem:[%s379_s19] ss:$0 sm:$0xff]  ;;  %v1142_v12 = vcombine.low %v395_v3, %v395_v3 }
  0x14   : > { %1194 = vmatprep.subr.bf16.mxu0 %v1339_v0 }
  0x16   : > { %523 = vrot.lane.b32.xlu1 %v1142_v12, %s1341_s20 }
  0x1a   : > { %1191 = vmatmul.mubr.msk.bf16.vlgmr.msra.gmra.mrb[0].mxu0 %vm404_vm1, %v395_v3  ;;  %634 = vrot.lane.b32.xlu1 %v1142_v12, %s1342_s21 }
  0x1b   : > { %1196 = vmatprep.mubr.msk.bf16.mxu0 %vm1340_vm0, %v1339_v0  ;;  %1195 = vmatpush3.bf16.msra.mxu0 %v1446_v18 }
  0x1c   : > { %1200 = vmatprep.subr.bf16.mxu0 %v1339_v0 }
  0x1e   : > { %747 = vrot.lane.b32.xlu1 %v1285_v1, %s1343_s22 }
  0x22   : > { %745 = vrot.lane.b32.xlu1 %v1142_v12, %s1343_s22 }
  0x84   : > { %v526_v19 = vpop.permute.xlu1 %525 }
  0x85   : > { %v531_v30 = vsel %vm404_vm1, %v526_v19, 0 }
  0x88   : > { %v524_v20 = vpop.permute.xlu1 %523 }
  0x8c   : > { %v635_v22 = vpop.permute.xlu1 %634 }
  0x90   : > { %v748_v25 = vpop.permute.xlu1 %747 }
  0x91   : > { %v753_v27 = vsel %vm404_vm1, %v748_v25, 0  ;;  %v1290_v25 = vld [vmem:[%s1561_s4 + $0x8] sm:$0xff]  }
  0x94   : > { %v746_v31 = vpop.permute.xlu1 %745 }
  0xed   : > { %v445_v4 = vpop.f32.mrb[0].mxu0 }
  0xee   : > { %v451_v6 = vmul.f32 0.17677669, %v445_v4  ;;  %v1192_v7 = vpop.f32.mrb[1].mxu0 }
  0xef   : > { %v448_v8 = vpop.f32.mrb[2].mxu0 }
  0xf0   : > { %v1193_v9 = vpop.f32.mrb[3].mxu0  ;;  %v458_v10 = vadd.f32 %v1435_v5, %v451_v6 }
  0xf2   : > { %v460_v11 = vsel %vm459_vm2, %v458_v10, -inf }
  0xf3   : > { %461 = vmax.xlane.f32.xlu0 %v460_v11 }
 0x180   : > { %v462_v13 = vpop.xlane.xlu0 %461 }
 0x181   : > { %v463_v14 = vsub.f32 %v458_v10, %v462_v13 }
 0x183   : > { %v464_v15 = vmul.f32 1.442695, %v463_v14 }
 0x185   : > { %1297 = vpow2.f32 %v464_v15 }
 0x18f   : > { %v1298_v16 = vpop.eup %1297 }
 0x190   : > { %v466_v17 = vsel %vm459_vm2, %v1298_v16, 0.0 }
 0x191   : > { %467 = vadd.xlane.f32.xlu0 %v466_v17 }
 0x1a7   : > { %636 = vrot.lane.b32.xlu0 %v1285_v1, %s1342_s21 }
 0x21e   : > { %v468_v21 = vpop.xlane.xlu0 %467 }
 0x21f   : > { %1299 = vrcp.f32 %v468_v21 }
 0x222   : > { %v637_v23 = vpop.permute.xlu0 %636 }
 0x223   : > { %v642_v24 = vsel %vm404_vm1, %v637_v23, 0 }
 0x224   : > { %1213 = vmatpush3.bf16.xpose.msra.mxu1 %v642_v24  ;;  %v1289_v24 = vld [vmem:[%s1561_s4] sm:$0xff]  }
 0x225   : > { %1224 = vmatprep.subr.bf16.mxu1 %v1339_v0 }
 0x229   : > { %v1300_v26 = vpop.eup %1299 }
 0x22a   : > { %v470_v28 = vmul.f32 %v1300_v26, %v1298_v16  ;;  %v1291_v26 = vld [vmem:[%s1561_s4 + $0x10] sm:$0xff]  }
 0x22b   : > { %1215 = vmatmul.mubr.msk.bf16.vlgmr.msra.gmra.mrb[0].mxu1 %vm404_vm1, %v635_v22 }
 0x22c   : > { %v471_v29 = vpack.c.bf16 %v470_v28, %v470_v28  ;;  %1225 = vmatpush3.bf16.xpose.msra.mxu1 %v753_v27  ;;  %1226 = vmatprep.mubr.msk.bf16.mxu1 %vm1340_vm0, %v1339_v0  ;;  %v1292_v27 = vld [vmem:[%s1561_s4 + $0x18] sm:$0xff]   ;;  %v1293_v28 = vld [vmem:[%s1561_s4 + $0x20] sm:$0xff]  }
 0x22d   : > { %1236 = vmatprep.subr.bf16.mxu1 %v1339_v0 }
 0x22e   : > { %1197 = vmatmul.mubr.msk.bf16.vlgmr.msra.gmra.mrb[4].mxu0 %vm459_vm2, %v471_v29  ;;  %v1294_v29 = vld [vmem:[%s1561_s4 + $0x28] sm:$0xff]  }
 0x22f   : > { %1201 = vmatpush3.bf16.xpose.msra.mxu0 %v531_v30  ;;  %1202 = vmatprep.mubr.msk.bf16.mxu0 %vm1340_vm0, %v1339_v0  ;;  %v1295_v30 = vld [vmem:[%s1561_s4 + $0x30] sm:$0xff]  }
 0x230   : > { %1206 = vmatprep.subr.bf16.mxu0 %v1339_v0 }
 0x233   : > { %1227 = vmatmul.mubr.msk.bf16.vlgmr.msra.gmra.mrb[4].mxu1 %vm404_vm1, %v746_v31 }
 0x234   : > { %1252 = vmatprep.mubr.msk.bf16.mxu1 %vm1340_vm0, %v1339_v0  ;;  %1237 = vmatpush3.bf16.msra.mxu1 %v1289_v24 }
 0x235   : > { %1238 = vmatprep.subr.bf16.mxu1 %v1339_v0 }
 0x236   : > { %1203 = vmatmul.mubr.msk.bf16.vlgmr.msra.gmra.mrb[8].mxu0 %vm404_vm1, %v524_v20 }
 0x237   : > { %1208 = vmatprep.mubr.msk.bf16.mxu0 %vm1340_vm0, %v1339_v0 }
 0x238   : > { %1239 = vmatpush3.bf16.msra.mxu1 %v1290_v25 }
 0x239   : > { %1240 = vmatprep.subr.bf16.mxu1 %v1339_v0 }
 0x23c   : > { %1241 = vmatpush3.bf16.msra.mxu1 %v1291_v26 }
 0x23d   : > { %1242 = vmatprep.subr.bf16.mxu1 %v1339_v0 }
 0x240   : > { %1243 = vmatpush3.bf16.msra.mxu1 %v1292_v27 }
 0x241   : > { %1244 = vmatprep.subr.bf16.mxu1 %v1339_v0 }
 0x244   : > { %1245 = vmatpush3.bf16.msra.mxu1 %v1293_v28 }
 0x245   : > { %1246 = vmatprep.subr.bf16.mxu1 %v1339_v0 }
 0x248   : > { %1247 = vmatpush3.bf16.msra.mxu1 %v1294_v29 }
 0x249   : > { %1248 = vmatprep.subr.bf16.mxu1 %v1339_v0 }
 0x24c   : > { %1249 = vmatpush3.bf16.msra.mxu1 %v1295_v30 }
 0x24d   : > { %1250 = vmatprep.subr.bf16.mxu1 %v1339_v0 }
 0x2fe   : > { %v678_v32 = vpop.f32.mrb[0].mxu1 }
 0x2ff   : > { %v684_v33 = vmul.f32 0.17677669, %v678_v32  ;;  %v1216_v34 = vpop.f32.mrb[1].mxu1  ;;  %v1296_v32 = vld [vmem:[%s1561_s4 + $0x38] sm:$0xff]  }
 0x300   : > { %v681_v35 = vpop.f32.mrb[2].mxu1  ;;  %1251 = vmatpush3.bf16.msra.mxu1 %v1296_v32 }
 0x301   : > { %v1469_v36 = vpop.f32.mrb[4].mxu0  ;;  %v1217_v37 = vpop.f32.mrb[3].mxu1  ;;  %v685_v38 = vadd.f32 %v1435_v5, %v684_v33 }
 0x302   : > { %v1198_v39 = vpop.f32.mrb[5].mxu0 }
 0x303   : > { %v516_v40 = vpop.f32.mrb[6].mxu0  ;;  %v686_v41 = vsel %vm459_vm2, %v685_v38, -inf }
 0x304   : > { %687 = vmax.xlane.f32.xlu0 %v686_v41  ;;  %v1199_v42 = vpop.f32.mrb[7].mxu0 }
 0x306   : > { %v789_v43 = vpop.f32.mrb[4].mxu1 }
 0x307   : > { %v1228_v44 = vpop.f32.mrb[5].mxu1  ;;  %v795_v45 = vmul.f32 0.17677669, %v789_v43 }
 0x308   : > { %v792_v46 = vpop.f32.mrb[6].mxu1 }
 0x309   : > { %v567_v47 = vpop.f32.mrb[8].mxu0  ;;  %v1229_v48 = vpop.f32.mrb[7].mxu1  ;;  %v796_v54 = vadd.f32 %v1435_v5, %v795_v45 }
 0x30a   : > { %v573_v49 = vmul.f32 0.17677669, %v567_v47  ;;  %v1204_v50 = vpop.f32.mrb[9].mxu0  ;;  %v519_v48 = vpack.c.bf16 %v1469_v36, %v1469_v36 }
 0x30b   : > { %v570_v51 = vpop.f32.mrb[10].mxu0  ;;  %v797_v56 = vsel %vm459_vm2, %v796_v54, -inf }
 0x30c   : > { %v1205_v52 = vpop.f32.mrb[11].mxu0  ;;  %v574_v53 = vadd.f32 %v1435_v5, %v573_v49 }
 0x30e   : > { %v575_v55 = vsel %vm459_vm2, %v574_v53, -inf }
 0x30f   : > { %576 = vmax.xlane.f32.xlu1 %v575_v55 }
 0x313   : > { %798 = vmax.xlane.f32.xlu1 %v797_v56 }
 0x391   : > { %v688_v57 = vpop.xlane.xlu0 %687 }
 0x392   : > { %v689_v58 = vsub.f32 %v685_v38, %v688_v57 }
 0x394   : > { %v690_v59 = vmul.f32 1.442695, %v689_v58 }
 0x396   : > { %1301 = vpow2.f32 %v690_v59 }
 0x39c   : > { %v577_v60 = vpop.xlane.xlu1 %576 }
 0x39d   : > { %v578_v61 = vsub.f32 %v574_v53, %v577_v60 }
 0x39f   : > { %v579_v3 = vmul.f32 1.442695, %v578_v61 }
 0x3a0   : > { %v1302_v62 = vpop.eup %1301  ;;  %v799_v63 = vpop.xlane.xlu1 %798 }
 0x3a1   : > { %v800_v1 = vsub.f32 %v796_v54, %v799_v63  ;;  %v692_v2 = vsel %vm459_vm2, %v1302_v62, 0.0  ;;  %v1149_v54 = vld [vmem:[%s1562_s5] ss:$0 sm:$0xff] }
 0x3a2   : > { %693 = vadd.xlane.f32.xlu0 %v692_v2 }
 0x3a3   : > { %v801_v4 = vmul.f32 1.442695, %v800_v1 }
 0x3a5   : > { %1303 = vpow2.f32 %v801_v4 }
 0x3a6   : > { %1305 = vpow2.f32 %v579_v3 }
 0x3af   : > { %v1304_v5 = vpop.eup %1303 }
 0x3b0   : > { %v803_v6 = vsel %vm459_vm2, %v1304_v5, 0.0  ;;  %v1306_v7 = vpop.eup %1305 }
 0x3b1   : > { %804 = vadd.xlane.f32.xlu1 %v803_v6  ;;  %v581_v8 = vsel %vm459_vm2, %v1306_v7, 0.0  ;;  %v1158_v6 = vld [vmem:[%s1563_s6] ss:$0 sm:$0xff] }
 0x3b5   : > { %582 = vadd.xlane.f32.xlu1 %v581_v8  ;;  %v1159_v8 = vld [vmem:[%s1564_s7] ss:$0 sm:$0xff] }
 0x3b8   : > { %587 = vrot.lane.b32.xlu0 %v1446_v18, %s1341_s20 }
 0x3c6   : > { %698 = vrot.lane.b32.xlu1 %v1446_v18, %s1342_s21 }
 0x3ca   : > { %809 = vrot.lane.b32.xlu1 %v1446_v18, %s1343_s22 }
 0x42f   : > { %v694_v9 = vpop.xlane.xlu0 %693 }
 0x433   : > { %v588_v10 = vpop.permute.xlu0 %587 }
 0x434   : > { %1207 = vmatpush3.bf16.msra.mxu0 %v588_v10 }
 0x435   : > { %1218 = vmatprep.subr.bf16.mxu0 %v1339_v0 }
 0x43e   : > { %v805_v11 = vpop.xlane.xlu1 %804 }
 0x442   : > { %v583_v12 = vpop.xlane.xlu1 %582 }
 0x443   : > { %1307 = vrcp.f32 %v583_v12 }
 0x444   : > { %1309 = vrcp.f32 %v694_v9 }
 0x445   : > { %1311 = vrcp.f32 %v805_v11 }
 0x446   : > { %v699_v15 = vpop.permute.xlu1 %698 }
 0x44a   : > { %v810_v19 = vpop.permute.xlu1 %809 }
 0x44d   : > { %v1308_v13 = vpop.eup %1307 }
 0x44e   : > { %v585_v14 = vmul.f32 %v1308_v13, %v1306_v7  ;;  %v1310_v17 = vpop.eup %1309 }
 0x44f   : > { %v696_v18 = vmul.f32 %v1310_v17, %v1302_v62  ;;  %v1312_v21 = vpop.eup %1311 }
 0x450   : > { %v586_v16 = vpack.c.bf16 %v585_v14, %v585_v14  ;;  %v807_v22 = vmul.f32 %v1312_v21, %v1304_v5 }
 0x451   : > { %v697_v20 = vpack.c.bf16 %v696_v18, %v696_v18 }
 0x452   : > { %1209 = vmatmul.mubr.msk.bf16.vlgmr.msra.gmra.mrb[12].mxu0 %vm459_vm2, %v586_v16  ;;  %v808_v23 = vpack.c.bf16 %v807_v22, %v807_v22 }
 0x453   : > { %1219 = vmatpush3.bf16.msra.mxu0 %v699_v15  ;;  %1220 = vmatprep.mubr.msk.bf16.mxu0 %vm1340_vm0, %v1339_v0 }
 0x454   : > { %1230 = vmatprep.subr.bf16.mxu0 %v1339_v0 }
 0x45a   : > { %1221 = vmatmul.mubr.msk.bf16.vlgmr.msra.gmra.mrb[16].mxu0 %vm459_vm2, %v697_v20 }
 0x45b   : > { %1231 = vmatpush3.bf16.msra.mxu0 %v810_v19  ;;  %1232 = vmatprep.mubr.msk.bf16.mxu0 %vm1340_vm0, %v1339_v0 }
 0x462   : > { %1233 = vmatmul.mubr.msk.bf16.vlgmr.msra.gmra.mrb[20].mxu0 %vm459_vm2, %v808_v23 }
 0x525   : > { %v627_v31 = vpop.f32.mrb[12].mxu0 }
 0x526   : > { %v633_v33 = vpack.c.bf16 %v627_v31, %v627_v31  ;;  %v1210_v34 = vpop.f32.mrb[13].mxu0 }
 0x527   : > { %v630_v35 = vpop.f32.mrb[14].mxu0 }
 0x528   : > { %857 = vrot.lane.b32.xlu0 %v633_v33, %s1343_s22  ;;  %v1211_v37 = vpop.f32.mrb[15].mxu0 }
 0x52d   : > { %v738_v38 = vpop.f32.mrb[16].mxu0 }
 0x52e   : > { %v744_v39 = vpack.c.bf16 %v738_v38, %v738_v38  ;;  %v1222_v40 = vpop.f32.mrb[17].mxu0 }
 0x52f   : > { %v741_v41 = vpop.f32.mrb[18].mxu0 }
 0x530   : > { %860 = vrot.lane.b32.xlu1 %v744_v39, %s1342_s21  ;;  %v1223_v42 = vpop.f32.mrb[19].mxu0  ;;  %s1135_s21 = sshll.u32 %s1571_s27, 3 }
 0x531   : > { %s386_s25 = scalar_lea.vmem %s1560_s3, %s1135_s21  ;;  %s393_s14 = scalar_lea.vmem %s1565_s8, %s1135_s21 }
 0x532   : > { %v986_v36 = vld [vmem:[%s386_s25] sm:$0xff] }
 0x535   : > { %v849_v43 = vpop.f32.mrb[20].mxu0 }
 0x536   : > { %v855_v44 = vpack.c.bf16 %v849_v43, %v849_v43  ;;  %v1234_v45 = vpop.f32.mrb[21].mxu0 }
 0x537   : > { %v852_v46 = vpop.f32.mrb[22].mxu0 }
 0x538   : > { %863 = vrot.lane.b32.xlu0 %v855_v44, %s1341_s20  ;;  %v1235_v0 = vpop.f32.mrb[23].mxu0 }
 0x59a   : > { %v858_v47 = vpop.permute.xlu0 %857 }
 0x59b   : > { %v867_v50 = vsel %vm404_vm1, %v519_v48, %v858_v47 }
 0x5a2   : > { %v861_v49 = vpop.permute.xlu1 %860 }
 0x5a3   : > { %v870_v51 = vsel %vm868_vm3, %v867_v50, %v861_v49 }
 0x5aa   : > { %v864_v52 = vpop.permute.xlu0 %863 }
 0x5ab   : > { %v873_v53 = vsel %vm871_vm4, %v870_v51, %v864_v52 }
 0x5ac   : > { %1253 = vmatmul.mubr.bf16.vlgmr.msra.gmra.mrb[8].mxu1 %v873_v53 }
 0x67f   : > { %v980_v55 = vpop.f32.mrb[8].mxu1 }
 0x680   : > { %v981_v56 = vadd.f32 %v1149_v54, %v980_v55  ;;  %v1254_v57 = vpop.f32.mrb[9].mxu1 }
 0x681   : > { %v983_v58 = vpop.f32.mrb[10].mxu1 }
 0x682   : > { %v1255_v59 = vpop.f32.mrb[11].mxu1  ;;  %v987_v60 = vadd.f32 %v986_v36, %v981_v56 }
 0x684   : > { %988 = vadd.xlane.f32.xlu1 %v987_v60 }
 0x711   : > { %v989_v61 = vpop.xlane.xlu1 %988 }
 0x712   : > { %v991_v62 = vmul.f32 0.0078125, %v989_v61 }
 0x714   : > { %v992_v63 = vsub.f32 %v987_v60, %v991_v62 }
 0x716   : > { %v993_v1 = vmul.f32 %v992_v63, %v992_v63 }
 0x718   : > { %994 = vadd.xlane.f32.xlu0 %v993_v1 }
 0x7a5   : > { %v995_v2 = vpop.xlane.xlu0 %994 }
 0x7a6   : > { %v996_v3 = vmul.f32 0.0078125, %v995_v2 }
 0x7a8   : > { %v997_v4 = vadd.f32 1e-05, %v996_v3 }
 0x7aa   : > { %1313 = vrsqrt.f32 %v997_v4 }
 0x7b4   : > { %v1314_v5 = vpop.eup %1313 }
 0x7b5   : > { %v999_v7 = vmul.f32 %v1314_v5, %v992_v63 }
 0x7b7   : > { %v1007_v9 = vmul.f32 %v1158_v6, %v999_v7 }
 0x7b9   : > { %v1015_v10 = vadd.f32 %v1159_v8, %v1007_v9 }
 0x7bb   : > { %1016 = vst [vmem:[%s393_s14] sm:$0xff] %v1015_v10 }
 0x7bc PF: > { %s18_s29 = sadd.s32 1, %s1337_s29   ;;  %s1566_s27 = smov %s1333_s28 }
 0x7bd   : > { %p15_p5 = scmp.ge.s32.totalorder %s18_s29, 4   ;;  %s1567_s28 = smov %s1569_s30 }
 0x7bf   :  { %17 = sbr.rel (!%p15_p5) target bundleno = 2 (0x2), region = 91 }

</bundles_post_ra>
